<compile_context>
chip_gen: v7x
topology: tpu7x:2x2x1
jax: 0.10.0
libtpu: 0.0.40
codegen_flags: <defaults>
</compile_context>

<pallas_src>
import functools

import jax
import jax.numpy as jnp
from jax.experimental import pallas as pl
from jax.experimental.pallas import tpu as pltpu


def _round_up(n, m):
    return ((n + m - 1) // m) * m


def gru_kernel(x_ref, wih_ref, whh_ref, bgi_ref, bhn_ref, h_out_ref, gi_ref,
               *, seq_len, chunk_len, batch_tile, hidden_pad, compute_dtype,
               needs_mask):
    """One (batch-tile, T-chunk) grid step of the GRU.

    x_ref:   (1, Tc*BT, I)   time-major chunk of the padded input
    wih_ref: (I, 3*Hp)       fused [r|z|n] input weights (gate-major lanes)
    whh_ref: (Hp, 3*Hp)      fused [r|z|n] hidden weights
    bgi_ref: (1, 3*Hp)       fused input-side bias: [b_ir+b_hr | b_iz+b_hz | b_in]
    bhn_ref: (1, Hp)         b_hn (must stay inside r * (...))
    h_out_ref: (BT, Hp)      hidden state; resident across T-chunks (same block)
    gi_ref:  (Tc*BT, 3*Hp)   f32 scratch for the chunk's input projections
    """
    hp = hidden_pad
    tc = pl.program_id(1)

    # ---- Phase 1: fused input projection for the whole chunk (MXU-friendly,
    # lane-dense 3*Hp output, single bias add).
    x2d = x_ref[0]                                            # (Tc*BT, I)
    gi_ref[...] = (
        jnp.dot(x2d, wih_ref[...], preferred_element_type=jnp.float32)
        + bgi_ref[...])

    whh = whh_ref[...]                                        # (Hp, 3*Hp)
    # Hoist the bias broadcast out of the loop (broadcasts are not CSE'd).
    bhn = jnp.broadcast_to(bhn_ref[...], (batch_tile, hp))

    # ---- Initialize the carried hidden state at the first T-chunk.
    @pl.when(tc == 0)
    def _():
        h_out_ref[...] = jnp.zeros_like(h_out_ref)

    def sigmoid(v):
        # One EUP op per gate instead of exp + divide.
        return 0.5 * (jnp.tanh(0.5 * v) + 1.0)

    # ---- Phase 2: serial recurrence; hidden state is a loop-carried value.
    def step(t, h):
        off = pl.multiple_of(t * batch_tile, batch_tile)
        gi = gi_ref[pl.ds(off, batch_tile), :]                # (BT, 3*Hp) f32
        gh = jnp.dot(h.astype(compute_dtype), whh,
                     preferred_element_type=jnp.float32)      # (BT, 3*Hp) f32
        r = sigmoid(gi[:, 0:hp] + gh[:, 0:hp])
        z = sigmoid(gi[:, hp:2 * hp] + gh[:, hp:2 * hp])
        n = jnp.tanh(gi[:, 2 * hp:3 * hp] + r * (gh[:, 2 * hp:3 * hp] + bhn))
        h_new = (1.0 - z) * n + z * h
        if needs_mask:
            # T was padded up to a multiple of chunk_len; freeze h on padding.
            valid = (tc * chunk_len + t) < seq_len
            h_new = jnp.where(valid, h_new, h)
        return h_new

    h0 = h_out_ref[...]
    h_last = jax.lax.fori_loop(0, chunk_len, step, h0,
                               unroll=min(chunk_len, 8))
    h_out_ref[...] = h_last


def gru_model_forward(x, params, compute_dtype=jnp.float32):
    B, T, I = x.shape
    H = params["whh"].shape[-1]
    Hp = _round_up(H, 128)                       # lane-pad hidden per gate

    # Batch tiling (grid axis 0, "parallel" -> can split across v7x cores).
    BT = 128 if B >= 128 else _round_up(max(B, 1), 8)
    Bp = _round_up(B, BT)
    n_btiles = Bp // BT

    # T chunking (grid axis 1, "arbitrary") bounds VMEM and streams x.
    Tc = min(T, 64)
    Tp = _round_up(T, Tc)
    n_tchunks = Tp // Tc
    needs_mask = Tp != T

    # (B,T,I) -> (n_btiles, Tp*BT, I): time-major within each batch tile so the
    # per-step gi slice is a contiguous (BT, 3Hp) block.
    x_tbi = jnp.transpose(x, (1, 0, 2))                              # (T,B,I)
    x_pad = jnp.pad(x_tbi, ((0, Tp - T), (0, Bp - B), (0, 0)))       # (Tp,Bp,I)
    x_arr = x_pad.reshape(Tp, n_btiles, BT, I)
    x_arr = jnp.transpose(x_arr, (1, 0, 2, 3)).reshape(n_btiles, Tp * BT, I)
    x_arr = x_arr.astype(compute_dtype)

    # Fused gate-major weights, each gate zero-padded to Hp lanes.
    def fuse_gates(w):                                               # (3,*,H)
        w = jnp.pad(w, ((0, 0), (0, 0), (0, Hp - H)))
        return jnp.concatenate([w[0], w[1], w[2]], axis=-1)          # (*,3Hp)

    wih_f = fuse_gates(params["wih"]).astype(compute_dtype)          # (I, 3Hp)
    whh_p = jnp.pad(params["whh"], ((0, 0), (0, Hp - H), (0, Hp - H)))
    whh_f = jnp.concatenate([whh_p[0], whh_p[1], whh_p[2]],
                            axis=-1).astype(compute_dtype)           # (Hp,3Hp)

    # Pre-fold biases: r/z use (b_ih + b_hh); the n gate keeps them split
    # because of the r * (h @ W_hn + b_hn) coupling.
    bih = jnp.pad(params["bih"], ((0, 0), (0, 0), (0, Hp - H)))      # (3,1,Hp)
    bhh = jnp.pad(params["bhh"], ((0, 0), (0, 0), (0, Hp - H)))
    b_gi = jnp.concatenate([bih[0] + bhh[0], bih[1] + bhh[1], bih[2]],
                           axis=-1).astype(jnp.float32)              # (1,3Hp)
    b_hn = bhh[2].astype(jnp.float32)                                # (1,Hp)

    # VMEM budget sized to the actual buffers (double-buffered x / out blocks,
    # resident weights, one f32 gi scratch); capped at 64 MiB (v7x physical).
    isz = jnp.dtype(compute_dtype).itemsize
    est = (2 * Tc * BT * I * isz
           + I * 3 * Hp * isz
           + Hp * 3 * Hp * isz
           + (3 * Hp + Hp) * 4
           + 2 * BT * Hp * 4
           + Tc * BT * 3 * Hp * 4)
    vmem_limit = int(min(max(2 * est + (4 << 20), 32 << 20), 64 << 20))

    kernel = functools.partial(
        gru_kernel, seq_len=T, chunk_len=Tc, batch_tile=BT, hidden_pad=Hp,
        compute_dtype=compute_dtype, needs_mask=needs_mask)

    h_last = pl.pallas_call(
        kernel,
        out_shape=jax.ShapeDtypeStruct((Bp, Hp), jnp.float32),
        grid_spec=pltpu.PrefetchScalarGridSpec(
            num_scalar_prefetch=0,
            grid=(n_btiles, n_tchunks),
            in_specs=[
                pl.BlockSpec((1, Tc * BT, I), lambda b, t: (b, t, 0)),
                pl.BlockSpec((I, 3 * Hp), lambda b, t: (0, 0)),
                pl.BlockSpec((Hp, 3 * Hp), lambda b, t: (0, 0)),
                pl.BlockSpec((1, 3 * Hp), lambda b, t: (0, 0)),
                pl.BlockSpec((1, Hp), lambda b, t: (0, 0)),
            ],
            out_specs=pl.BlockSpec((BT, Hp), lambda b, t: (b, 0)),
            scratch_shapes=[pltpu.VMEM((Tc * BT, 3 * Hp), jnp.float32)],
        ),
        compiler_params=pltpu.CompilerParams(
            dimension_semantics=("parallel", "arbitrary"),
            vmem_limit_bytes=vmem_limit),
    )(x_arr, wih_f, whh_f, b_gi, b_hn)

    # Final FC (out[:, -1, :] @ W_fc^T + b_fc): tiny matvec, leave to XLA.
    return h_last[:B, :H] @ params["wfc"] + params["bfc"]


def gru_model_reference(x, params):
    """Pure-JAX reference with identical PyTorch GRU semantics."""
    B, T, I = x.shape
    wih, whh, bih, bhh = params["wih"], params["whh"], params["bih"], params["bhh"]
    H = whh.shape[-1]

    def step(h, x_t):
        gi = [x_t @ wih[g] + bih[g] for g in range(3)]
        gh = [h @ whh[g] + bhh[g] for g in range(3)]
        r = jax.nn.sigmoid(gi[0] + gh[0])
        z = jax.nn.sigmoid(gi[1] + gh[1])
        n = jnp.tanh(gi[2] + r * gh[2])
        return (1.0 - z) * n + z * h, None

    h0 = jnp.zeros((B, H), jnp.float32)
    h_last, _ = jax.lax.scan(step, h0, jnp.transpose(x, (1, 0, 2)))
    return h_last @ params["wfc"] + params["bfc"]


def init_params(key, input_size, hidden_size):
    """Deterministic init mirroring PyTorch GRU/Linear uniform(-1/sqrt(H), 1/sqrt(H)).

    Weights are stored gate-major [r, z, n] and pre-transposed so the kernel
    computes x @ W / h @ W directly from lane-aligned gate tiles.
    (Note: wfc is (H, 1), i.e. already transposed vs. torch Linear.weight.)
    """
    k = 1.0 / jnp.sqrt(jnp.float32(hidden_size))
    keys = jax.random.split(key, 6)
    u = lambda kk, shape: jax.random.uniform(kk, shape, jnp.float32, -k, k)
    return {
        "wih": u(keys[0], (3, input_size, hidden_size)),
        "whh": u(keys[1], (3, hidden_size, hidden_size)),
        "bih": u(keys[2], (3, 1, hidden_size)),
        "bhh": u(keys[3], (3, 1, hidden_size)),
        "wfc": u(keys[4], (hidden_size, 1)),
        "bfc": u(keys[5], (1, 1)),
    }


if __name__ == "__main__":
    B, T, I, H = 2, 8, 4, 32

    key = jax.random.PRNGKey(0)
    key_x, key_p = jax.random.split(key)
    x = jax.random.normal(key_x, (B, T, I), jnp.float32)
    params = init_params(key_p, I, H)

    ref = jax.block_until_ready(gru_model_reference(x, params))

    # f32 path: strict check against the PyTorch-semantics reference.
    forward = jax.jit(gru_model_forward)
    out = jax.block_until_ready(forward(x, params))
    assert out.shape == (B, 1)
    assert jnp.allclose(out, ref, atol=1e-4, rtol=1e-4), (out, ref)

    # bf16 matmul-input path (halved VMEM/HBM traffic; f32 accumulation and
    # f32 gate math) -- looser tolerance for the reduced-precision inputs.
    forward_bf16 = jax.jit(
        functools.partial(gru_model_forward, compute_dtype=jnp.bfloat16))
    out_bf16 = jax.block_until_ready(forward_bf16(x, params))
    assert out_bf16.shape == (B, 1)
    assert jnp.allclose(out_bf16, ref, atol=1e-1, rtol=1e-1), (out_bf16, ref)

    print("KERNEL_OK")
</pallas_src>

<mosaic_0001>
module attributes {stable_mosaic.version = 11 : i64} {
  func.func @gru_kernel(%arg0: i32, %arg1: i32, %arg2: memref<1x64x4xf32, #tpu.memory_space<vmem>>, %arg3: memref<4x384xf32, #tpu.memory_space<vmem>>, %arg4: memref<128x384xf32, #tpu.memory_space<vmem>>, %arg5: memref<1x384xf32, #tpu.memory_space<vmem>>, %arg6: memref<1x128xf32, #tpu.memory_space<vmem>>, %arg7: memref<8x128xf32, #tpu.memory_space<vmem>>, %arg8: memref<64x384xf32, #tpu.memory_space<vmem>>) attributes {dimension_semantics = [#tpu.dimension_semantics<parallel>, #tpu.dimension_semantics<arbitrary>], iteration_bounds = array<i64: 1, 1>, scalar_prefetch = 0 : i64, scratch_operands = 1 : i64, tpu.core_type = #tpu.core_type<tc>, window_params = [{transform_indices = @transform_0, window_bounds = array<i64: 1, 64, 4>}, {pipeline_mode = #tpu.pipeline_mode<synchronous>, transform_indices = @transform_1, window_bounds = array<i64: 4, 384>}, {pipeline_mode = #tpu.pipeline_mode<synchronous>, transform_indices = @transform_2, window_bounds = array<i64: 128, 384>}, {pipeline_mode = #tpu.pipeline_mode<synchronous>, transform_indices = @transform_3, window_bounds = array<i64: 1, 384>}, {pipeline_mode = #tpu.pipeline_mode<synchronous>, transform_indices = @transform_4, window_bounds = array<i64: 1, 128>}, {transform_indices = @transform_5, window_bounds = array<i64: 8, 128>}]} {
    %c0 = arith.constant 0 : index
    %c0_0 = arith.constant 0 : index
    %c0_1 = arith.constant 0 : index
    %0 = vector.load %arg2[%c0, %c0_0, %c0_1] : memref<1x64x4xf32, #tpu.memory_space<vmem>>, vector<1x64x4xf32>
    %1 = vector.shape_cast %0 : vector<1x64x4xf32> to vector<64x4xf32>
    %c0_2 = arith.constant 0 : index
    %c0_3 = arith.constant 0 : index
    %2 = vector.load %arg3[%c0_2, %c0_3] : memref<4x384xf32, #tpu.memory_space<vmem>>, vector<4x384xf32>
    %cst = arith.constant dense<0.000000e+00> : vector<64x384xf32>
    %3 = tpu.matmul %1, %2, %cst {dimension_numbers = #tpu.dot_dimension_numbers<[1], [0], [0], [1], [0, 0, 1, 1], [], []>} : vector<64x4xf32>, vector<4x384xf32>, vector<64x384xf32> -> vector<64x384xf32>
    %c0_4 = arith.constant 0 : index
    %c0_5 = arith.constant 0 : index
    %4 = vector.load %arg5[%c0_4, %c0_5] : memref<1x384xf32, #tpu.memory_space<vmem>>, vector<1x384xf32>
    %5 = vector.broadcast %4 : vector<1x384xf32> to vector<64x384xf32>
    %6 = arith.addf %3, %5 : vector<64x384xf32>
    %c0_6 = arith.constant 0 : index
    %c0_7 = arith.constant 0 : index
    %7 = vector.load %arg8[%c0_6, %c0_7] : memref<64x384xf32, #tpu.memory_space<vmem>>, vector<64x384xf32>
    tpu.vector_store %arg8[%c0_6, %c0_7], %6 {strides = array<i32>} : memref<64x384xf32, #tpu.memory_space<vmem>>, vector<64x384xf32>,
    %c0_8 = arith.constant 0 : index
    %c0_9 = arith.constant 0 : index
    %8 = vector.load %arg4[%c0_8, %c0_9] : memref<128x384xf32, #tpu.memory_space<vmem>>, vector<128x384xf32>
    %c0_10 = arith.constant 0 : index
    %c0_11 = arith.constant 0 : index
    %9 = vector.load %arg6[%c0_10, %c0_11] : memref<1x128xf32, #tpu.memory_space<vmem>>, vector<1x128xf32>
    %10 = vector.shape_cast %9 : vector<1x128xf32> to vector<1x128xf32>
    %11 = vector.broadcast %10 : vector<1x128xf32> to vector<8x128xf32>
    %c0_i32 = arith.constant 0 : i32
    %12 = arith.cmpi eq, %arg1, %c0_i32 : i32
    %13 = arith.extui %12 : i1 to i32
    %c0_i32_12 = arith.constant 0 : i32
    %14 = arith.cmpi ne, %13, %c0_i32_12 : i32
    scf.if %14 {
      %cst_98 = arith.constant 0.000000e+00 : f32
      %305 = vector.broadcast %cst_98 : f32 to vector<8x128xf32>
      %c0_99 = arith.constant 0 : index
      %c0_100 = arith.constant 0 : index
      %306 = vector.load %arg7[%c0_99, %c0_100] : memref<8x128xf32, #tpu.memory_space<vmem>>, vector<8x128xf32>
      tpu.vector_store %arg7[%c0_99, %c0_100], %305 {strides = array<i32>} : memref<8x128xf32, #tpu.memory_space<vmem>>, vector<8x128xf32>,
    } else {
    }
    %c0_13 = arith.constant 0 : index
    %c0_14 = arith.constant 0 : index
    %15 = vector.load %arg7[%c0_13, %c0_14] : memref<8x128xf32, #tpu.memory_space<vmem>>, vector<8x128xf32>
    %c0_i32_15 = arith.constant 0 : i32
    %c8_i32 = arith.constant 8 : i32
    %16 = arith.muli %c0_i32_15, %c8_i32 : i32
    %17 = tpu.assume_multiple %16, 8 : i32
    %18 = arith.index_cast %17 : i32 to index
    %c0_16 = arith.constant 0 : index
    %19 = vector.load %arg8[%18, %c0_16] : memref<64x384xf32, #tpu.memory_space<vmem>>, vector<8x384xf32>
    %cst_17 = arith.constant dense<0.000000e+00> : vector<8x384xf32>
    %20 = tpu.matmul %15, %8, %cst_17 {dimension_numbers = #tpu.dot_dimension_numbers<[1], [0], [0], [1], [0, 0, 1, 1], [], []>} : vector<8x128xf32>, vector<128x384xf32>, vector<8x384xf32> -> vector<8x384xf32>
    %21 = vector.extract_strided_slice %19 {offsets = [0, 0], sizes = [8, 128], strides = [1, 1]} : vector<8x384xf32> to vector<8x128xf32>
    %22 = vector.extract_strided_slice %20 {offsets = [0, 0], sizes = [8, 128], strides = [1, 1]} : vector<8x384xf32> to vector<8x128xf32>
    %23 = arith.addf %21, %22 : vector<8x128xf32>
    %cst_18 = arith.constant 5.000000e-01 : f32
    %24 = vector.broadcast %cst_18 : f32 to vector<8x128xf32>
    %25 = arith.mulf %24, %23 : vector<8x128xf32>
    %26 = math.tanh %25 : vector<8x128xf32>
    %cst_19 = arith.constant 1.000000e+00 : f32
    %27 = vector.broadcast %cst_19 : f32 to vector<8x128xf32>
    %28 = arith.addf %26, %27 : vector<8x128xf32>
    %cst_20 = arith.constant 5.000000e-01 : f32
    %29 = vector.broadcast %cst_20 : f32 to vector<8x128xf32>
    %30 = arith.mulf %29, %28 : vector<8x128xf32>
    %31 = vector.extract_strided_slice %19 {offsets = [0, 128], sizes = [8, 128], strides = [1, 1]} : vector<8x384xf32> to vector<8x128xf32>
    %32 = vector.extract_strided_slice %20 {offsets = [0, 128], sizes = [8, 128], strides = [1, 1]} : vector<8x384xf32> to vector<8x128xf32>
    %33 = arith.addf %31, %32 : vector<8x128xf32>
    %cst_21 = arith.constant 5.000000e-01 : f32
    %34 = vector.broadcast %cst_21 : f32 to vector<8x128xf32>
    %35 = arith.mulf %34, %33 : vector<8x128xf32>
    %36 = math.tanh %35 : vector<8x128xf32>
    %cst_22 = arith.constant 1.000000e+00 : f32
    %37 = vector.broadcast %cst_22 : f32 to vector<8x128xf32>
    %38 = arith.addf %36, %37 : vector<8x128xf32>
    %cst_23 = arith.constant 5.000000e-01 : f32
    %39 = vector.broadcast %cst_23 : f32 to vector<8x128xf32>
    %40 = arith.mulf %39, %38 : vector<8x128xf32>
    %41 = vector.extract_strided_slice %19 {offsets = [0, 256], sizes = [8, 128], strides = [1, 1]} : vector<8x384xf32> to vector<8x128xf32>
    %42 = vector.extract_strided_slice %20 {offsets = [0, 256], sizes = [8, 128], strides = [1, 1]} : vector<8x384xf32> to vector<8x128xf32>
    %43 = arith.addf %42, %11 : vector<8x128xf32>
    %44 = arith.mulf %30, %43 : vector<8x128xf32>
    %45 = arith.addf %41, %44 : vector<8x128xf32>
    %46 = math.tanh %45 : vector<8x128xf32>
    %cst_24 = arith.constant 1.000000e+00 : f32
    %47 = vector.broadcast %cst_24 : f32 to vector<8x128xf32>
    %48 = arith.subf %47, %40 : vector<8x128xf32>
    %49 = arith.mulf %48, %46 : vector<8x128xf32>
    %50 = arith.mulf %40, %15 : vector<8x128xf32>
    %51 = arith.addf %49, %50 : vector<8x128xf32>
    %c1_i32 = arith.constant 1 : i32
    %c8_i32_25 = arith.constant 8 : i32
    %52 = arith.muli %c1_i32, %c8_i32_25 : i32
    %53 = tpu.assume_multiple %52, 8 : i32
    %54 = arith.index_cast %53 : i32 to index
    %c0_26 = arith.constant 0 : index
    %55 = vector.load %arg8[%54, %c0_26] : memref<64x384xf32, #tpu.memory_space<vmem>>, vector<8x384xf32>
    %cst_27 = arith.constant dense<0.000000e+00> : vector<8x384xf32>
    %56 = tpu.matmul %51, %8, %cst_27 {dimension_numbers = #tpu.dot_dimension_numbers<[1], [0], [0], [1], [0, 0, 1, 1], [], []>} : vector<8x128xf32>, vector<128x384xf32>, vector<8x384xf32> -> vector<8x384xf32>
    %57 = vector.extract_strided_slice %55 {offsets = [0, 0], sizes = [8, 128], strides = [1, 1]} : vector<8x384xf32> to vector<8x128xf32>
    %58 = vector.extract_strided_slice %56 {offsets = [0, 0], sizes = [8, 128], strides = [1, 1]} : vector<8x384xf32> to vector<8x128xf32>
    %59 = arith.addf %57, %58 : vector<8x128xf32>
    %cst_28 = arith.constant 5.000000e-01 : f32
    %60 = vector.broadcast %cst_28 : f32 to vector<8x128xf32>
    %61 = arith.mulf %60, %59 : vector<8x128xf32>
    %62 = math.tanh %61 : vector<8x128xf32>
    %cst_29 = arith.constant 1.000000e+00 : f32
    %63 = vector.broadcast %cst_29 : f32 to vector<8x128xf32>
    %64 = arith.addf %62, %63 : vector<8x128xf32>
    %cst_30 = arith.constant 5.000000e-01 : f32
    %65 = vector.broadcast %cst_30 : f32 to vector<8x128xf32>
    %66 = arith.mulf %65, %64 : vector<8x128xf32>
    %67 = vector.extract_strided_slice %55 {offsets = [0, 128], sizes = [8, 128], strides = [1, 1]} : vector<8x384xf32> to vector<8x128xf32>
    %68 = vector.extract_strided_slice %56 {offsets = [0, 128], sizes = [8, 128], strides = [1, 1]} : vector<8x384xf32> to vector<8x128xf32>
    %69 = arith.addf %67, %68 : vector<8x128xf32>
    %cst_31 = arith.constant 5.000000e-01 : f32
    %70 = vector.broadcast %cst_31 : f32 to vector<8x128xf32>
    %71 = arith.mulf %70, %69 : vector<8x128xf32>
    %72 = math.tanh %71 : vector<8x128xf32>
    %cst_32 = arith.constant 1.000000e+00 : f32
    %73 = vector.broadcast %cst_32 : f32 to vector<8x128xf32>
    %74 = arith.addf %72, %73 : vector<8x128xf32>
    %cst_33 = arith.constant 5.000000e-01 : f32
    %75 = vector.broadcast %cst_33 : f32 to vector<8x128xf32>
    %76 = arith.mulf %75, %74 : vector<8x128xf32>
    %77 = vector.extract_strided_slice %55 {offsets = [0, 256], sizes = [8, 128], strides = [1, 1]} : vector<8x384xf32> to vector<8x128xf32>
    %78 = vector.extract_strided_slice %56 {offsets = [0, 256], sizes = [8, 128], strides = [1, 1]} : vector<8x384xf32> to vector<8x128xf32>
    %79 = arith.addf %78, %11 : vector<8x128xf32>
    %80 = arith.mulf %66, %79 : vector<8x128xf32>
    %81 = arith.addf %77, %80 : vector<8x128xf32>
    %82 = math.tanh %81 : vector<8x128xf32>
    %cst_34 = arith.constant 1.000000e+00 : f32
    %83 = vector.broadcast %cst_34 : f32 to vector<8x128xf32>
    %84 = arith.subf %83, %76 : vector<8x128xf32>
    %85 = arith.mulf %84, %82 : vector<8x128xf32>
    %86 = arith.mulf %76, %51 : vector<8x128xf32>
    %87 = arith.addf %85, %86 : vector<8x128xf32>
    %c2_i32 = arith.constant 2 : i32
    %c8_i32_35 = arith.constant 8 : i32
    %88 = arith.muli %c2_i32, %c8_i32_35 : i32
    %89 = tpu.assume_multiple %88, 8 : i32
    %90 = arith.index_cast %89 : i32 to index
    %c0_36 = arith.constant 0 : index
    %91 = vector.load %arg8[%90, %c0_36] : memref<64x384xf32, #tpu.memory_space<vmem>>, vector<8x384xf32>
    %cst_37 = arith.constant dense<0.000000e+00> : vector<8x384xf32>
    %92 = tpu.matmul %87, %8, %cst_37 {dimension_numbers = #tpu.dot_dimension_numbers<[1], [0], [0], [1], [0, 0, 1, 1], [], []>} : vector<8x128xf32>, vector<128x384xf32>, vector<8x384xf32> -> vector<8x384xf32>
    %93 = vector.extract_strided_slice %91 {offsets = [0, 0], sizes = [8, 128], strides = [1, 1]} : vector<8x384xf32> to vector<8x128xf32>
    %94 = vector.extract_strided_slice %92 {offsets = [0, 0], sizes = [8, 128], strides = [1, 1]} : vector<8x384xf32> to vector<8x128xf32>
    %95 = arith.addf %93, %94 : vector<8x128xf32>
    %cst_38 = arith.constant 5.000000e-01 : f32
    %96 = vector.broadcast %cst_38 : f32 to vector<8x128xf32>
    %97 = arith.mulf %96, %95 : vector<8x128xf32>
    %98 = math.tanh %97 : vector<8x128xf32>
    %cst_39 = arith.constant 1.000000e+00 : f32
    %99 = vector.broadcast %cst_39 : f32 to vector<8x128xf32>
    %100 = arith.addf %98, %99 : vector<8x128xf32>
    %cst_40 = arith.constant 5.000000e-01 : f32
    %101 = vector.broadcast %cst_40 : f32 to vector<8x128xf32>
    %102 = arith.mulf %101, %100 : vector<8x128xf32>
    %103 = vector.extract_strided_slice %91 {offsets = [0, 128], sizes = [8, 128], strides = [1, 1]} : vector<8x384xf32> to vector<8x128xf32>
    %104 = vector.extract_strided_slice %92 {offsets = [0, 128], sizes = [8, 128], strides = [1, 1]} : vector<8x384xf32> to vector<8x128xf32>
    %105 = arith.addf %103, %104 : vector<8x128xf32>
    %cst_41 = arith.constant 5.000000e-01 : f32
    %106 = vector.broadcast %cst_41 : f32 to vector<8x128xf32>
    %107 = arith.mulf %106, %105 : vector<8x128xf32>
    %108 = math.tanh %107 : vector<8x128xf32>
    %cst_42 = arith.constant 1.000000e+00 : f32
    %109 = vector.broadcast %cst_42 : f32 to vector<8x128xf32>
    %110 = arith.addf %108, %109 : vector<8x128xf32>
    %cst_43 = arith.constant 5.000000e-01 : f32
    %111 = vector.broadcast %cst_43 : f32 to vector<8x128xf32>
    %112 = arith.mulf %111, %110 : vector<8x128xf32>
    %113 = vector.extract_strided_slice %91 {offsets = [0, 256], sizes = [8, 128], strides = [1, 1]} : vector<8x384xf32> to vector<8x128xf32>
    %114 = vector.extract_strided_slice %92 {offsets = [0, 256], sizes = [8, 128], strides = [1, 1]} : vector<8x384xf32> to vector<8x128xf32>
    %115 = arith.addf %114, %11 : vector<8x128xf32>
    %116 = arith.mulf %102, %115 : vector<8x128xf32>
    %117 = arith.addf %113, %116 : vector<8x128xf32>
    %118 = math.tanh %117 : vector<8x128xf32>
    %cst_44 = arith.constant 1.000000e+00 : f32
    %119 = vector.broadcast %cst_44 : f32 to vector<8x128xf32>
    %120 = arith.subf %119, %112 : vector<8x128xf32>
    %121 = arith.mulf %120, %118 : vector<8x128xf32>
    %122 = arith.mulf %112, %87 : vector<8x128xf32>
    %123 = arith.addf %121, %122 : vector<8x128xf32>
    %c3_i32 = arith.constant 3 : i32
    %c8_i32_45 = arith.constant 8 : i32
    %124 = arith.muli %c3_i32, %c8_i32_45 : i32
    %125 = tpu.assume_multiple %124, 8 : i32
    %126 = arith.index_cast %125 : i32 to index
    %c0_46 = arith.constant 0 : index
    %127 = vector.load %arg8[%126, %c0_46] : memref<64x384xf32, #tpu.memory_space<vmem>>, vector<8x384xf32>
    %cst_47 = arith.constant dense<0.000000e+00> : vector<8x384xf32>
    %128 = tpu.matmul %123, %8, %cst_47 {dimension_numbers = #tpu.dot_dimension_numbers<[1], [0], [0], [1], [0, 0, 1, 1], [], []>} : vector<8x128xf32>, vector<128x384xf32>, vector<8x384xf32> -> vector<8x384xf32>
    %129 = vector.extract_strided_slice %127 {offsets = [0, 0], sizes = [8, 128], strides = [1, 1]} : vector<8x384xf32> to vector<8x128xf32>
    %130 = vector.extract_strided_slice %128 {offsets = [0, 0], sizes = [8, 128], strides = [1, 1]} : vector<8x384xf32> to vector<8x128xf32>
    %131 = arith.addf %129, %130 : vector<8x128xf32>
    %cst_48 = arith.constant 5.000000e-01 : f32
    %132 = vector.broadcast %cst_48 : f32 to vector<8x128xf32>
    %133 = arith.mulf %132, %131 : vector<8x128xf32>
    %134 = math.tanh %133 : vector<8x128xf32>
    %cst_49 = arith.constant 1.000000e+00 : f32
    %135 = vector.broadcast %cst_49 : f32 to vector<8x128xf32>
    %136 = arith.addf %134, %135 : vector<8x128xf32>
    %cst_50 = arith.constant 5.000000e-01 : f32
    %137 = vector.broadcast %cst_50 : f32 to vector<8x128xf32>
    %138 = arith.mulf %137, %136 : vector<8x128xf32>
    %139 = vector.extract_strided_slice %127 {offsets = [0, 128], sizes = [8, 128], strides = [1, 1]} : vector<8x384xf32> to vector<8x128xf32>
    %140 = vector.extract_strided_slice %128 {offsets = [0, 128], sizes = [8, 128], strides = [1, 1]} : vector<8x384xf32> to vector<8x128xf32>
    %141 = arith.addf %139, %140 : vector<8x128xf32>
    %cst_51 = arith.constant 5.000000e-01 : f32
    %142 = vector.broadcast %cst_51 : f32 to vector<8x128xf32>
    %143 = arith.mulf %142, %141 : vector<8x128xf32>
    %144 = math.tanh %143 : vector<8x128xf32>
    %cst_52 = arith.constant 1.000000e+00 : f32
    %145 = vector.broadcast %cst_52 : f32 to vector<8x128xf32>
    %146 = arith.addf %144, %145 : vector<8x128xf32>
    %cst_53 = arith.constant 5.000000e-01 : f32
    %147 = vector.broadcast %cst_53 : f32 to vector<8x128xf32>
    %148 = arith.mulf %147, %146 : vector<8x128xf32>
    %149 = vector.extract_strided_slice %127 {offsets = [0, 256], sizes = [8, 128], strides = [1, 1]} : vector<8x384xf32> to vector<8x128xf32>
    %150 = vector.extract_strided_slice %128 {offsets = [0, 256], sizes = [8, 128], strides = [1, 1]} : vector<8x384xf32> to vector<8x128xf32>
    %151 = arith.addf %150, %11 : vector<8x128xf32>
    %152 = arith.mulf %138, %151 : vector<8x128xf32>
    %153 = arith.addf %149, %152 : vector<8x128xf32>
    %154 = math.tanh %153 : vector<8x128xf32>
    %cst_54 = arith.constant 1.000000e+00 : f32
    %155 = vector.broadcast %cst_54 : f32 to vector<8x128xf32>
    %156 = arith.subf %155, %148 : vector<8x128xf32>
    %157 = arith.mulf %156, %154 : vector<8x128xf32>
    %158 = arith.mulf %148, %123 : vector<8x128xf32>
    %159 = arith.addf %157, %158 : vector<8x128xf32>
    %c4_i32 = arith.constant 4 : i32
    %c8_i32_55 = arith.constant 8 : i32
    %160 = arith.muli %c4_i32, %c8_i32_55 : i32
    %161 = tpu.assume_multiple %160, 8 : i32
    %162 = arith.index_cast %161 : i32 to index
    %c0_56 = arith.constant 0 : index
    %163 = vector.load %arg8[%162, %c0_56] : memref<64x384xf32, #tpu.memory_space<vmem>>, vector<8x384xf32>
    %cst_57 = arith.constant dense<0.000000e+00> : vector<8x384xf32>
    %164 = tpu.matmul %159, %8, %cst_57 {dimension_numbers = #tpu.dot_dimension_numbers<[1], [0], [0], [1], [0, 0, 1, 1], [], []>} : vector<8x128xf32>, vector<128x384xf32>, vector<8x384xf32> -> vector<8x384xf32>
    %165 = vector.extract_strided_slice %163 {offsets = [0, 0], sizes = [8, 128], strides = [1, 1]} : vector<8x384xf32> to vector<8x128xf32>
    %166 = vector.extract_strided_slice %164 {offsets = [0, 0], sizes = [8, 128], strides = [1, 1]} : vector<8x384xf32> to vector<8x128xf32>
    %167 = arith.addf %165, %166 : vector<8x128xf32>
    %cst_58 = arith.constant 5.000000e-01 : f32
    %168 = vector.broadcast %cst_58 : f32 to vector<8x128xf32>
    %169 = arith.mulf %168, %167 : vector<8x128xf32>
    %170 = math.tanh %169 : vector<8x128xf32>
    %cst_59 = arith.constant 1.000000e+00 : f32
    %171 = vector.broadcast %cst_59 : f32 to vector<8x128xf32>
    %172 = arith.addf %170, %171 : vector<8x128xf32>
    %cst_60 = arith.constant 5.000000e-01 : f32
    %173 = vector.broadcast %cst_60 : f32 to vector<8x128xf32>
    %174 = arith.mulf %173, %172 : vector<8x128xf32>
    %175 = vector.extract_strided_slice %163 {offsets = [0, 128], sizes = [8, 128], strides = [1, 1]} : vector<8x384xf32> to vector<8x128xf32>
    %176 = vector.extract_strided_slice %164 {offsets = [0, 128], sizes = [8, 128], strides = [1, 1]} : vector<8x384xf32> to vector<8x128xf32>
    %177 = arith.addf %175, %176 : vector<8x128xf32>
    %cst_61 = arith.constant 5.000000e-01 : f32
    %178 = vector.broadcast %cst_61 : f32 to vector<8x128xf32>
    %179 = arith.mulf %178, %177 : vector<8x128xf32>
    %180 = math.tanh %179 : vector<8x128xf32>
    %cst_62 = arith.constant 1.000000e+00 : f32
    %181 = vector.broadcast %cst_62 : f32 to vector<8x128xf32>
    %182 = arith.addf %180, %181 : vector<8x128xf32>
    %cst_63 = arith.constant 5.000000e-01 : f32
    %183 = vector.broadcast %cst_63 : f32 to vector<8x128xf32>
    %184 = arith.mulf %183, %182 : vector<8x128xf32>
    %185 = vector.extract_strided_slice %163 {offsets = [0, 256], sizes = [8, 128], strides = [1, 1]} : vector<8x384xf32> to vector<8x128xf32>
    %186 = vector.extract_strided_slice %164 {offsets = [0, 256], sizes = [8, 128], strides = [1, 1]} : vector<8x384xf32> to vector<8x128xf32>
    %187 = arith.addf %186, %11 : vector<8x128xf32>
    %188 = arith.mulf %174, %187 : vector<8x128xf32>
    %189 = arith.addf %185, %188 : vector<8x128xf32>
    %190 = math.tanh %189 : vector<8x128xf32>
    %cst_64 = arith.constant 1.000000e+00 : f32
    %191 = vector.broadcast %cst_64 : f32 to vector<8x128xf32>
    %192 = arith.subf %191, %184 : vector<8x128xf32>
    %193 = arith.mulf %192, %190 : vector<8x128xf32>
    %194 = arith.mulf %184, %159 : vector<8x128xf32>
    %195 = arith.addf %193, %194 : vector<8x128xf32>
    %c5_i32 = arith.constant 5 : i32
    %c8_i32_65 = arith.constant 8 : i32
    %196 = arith.muli %c5_i32, %c8_i32_65 : i32
    %197 = tpu.assume_multiple %196, 8 : i32
    %198 = arith.index_cast %197 : i32 to index
    %c0_66 = arith.constant 0 : index
    %199 = vector.load %arg8[%198, %c0_66] : memref<64x384xf32, #tpu.memory_space<vmem>>, vector<8x384xf32>
    %cst_67 = arith.constant dense<0.000000e+00> : vector<8x384xf32>
    %200 = tpu.matmul %195, %8, %cst_67 {dimension_numbers = #tpu.dot_dimension_numbers<[1], [0], [0], [1], [0, 0, 1, 1], [], []>} : vector<8x128xf32>, vector<128x384xf32>, vector<8x384xf32> -> vector<8x384xf32>
    %201 = vector.extract_strided_slice %199 {offsets = [0, 0], sizes = [8, 128], strides = [1, 1]} : vector<8x384xf32> to vector<8x128xf32>
    %202 = vector.extract_strided_slice %200 {offsets = [0, 0], sizes = [8, 128], strides = [1, 1]} : vector<8x384xf32> to vector<8x128xf32>
    %203 = arith.addf %201, %202 : vector<8x128xf32>
    %cst_68 = arith.constant 5.000000e-01 : f32
    %204 = vector.broadcast %cst_68 : f32 to vector<8x128xf32>
    %205 = arith.mulf %204, %203 : vector<8x128xf32>
    %206 = math.tanh %205 : vector<8x128xf32>
    %cst_69 = arith.constant 1.000000e+00 : f32
    %207 = vector.broadcast %cst_69 : f32 to vector<8x128xf32>
    %208 = arith.addf %206, %207 : vector<8x128xf32>
    %cst_70 = arith.constant 5.000000e-01 : f32
    %209 = vector.broadcast %cst_70 : f32 to vector<8x128xf32>
    %210 = arith.mulf %209, %208 : vector<8x128xf32>
    %211 = vector.extract_strided_slice %199 {offsets = [0, 128], sizes = [8, 128], strides = [1, 1]} : vector<8x384xf32> to vector<8x128xf32>
    %212 = vector.extract_strided_slice %200 {offsets = [0, 128], sizes = [8, 128], strides = [1, 1]} : vector<8x384xf32> to vector<8x128xf32>
    %213 = arith.addf %211, %212 : vector<8x128xf32>
    %cst_71 = arith.constant 5.000000e-01 : f32
    %214 = vector.broadcast %cst_71 : f32 to vector<8x128xf32>
    %215 = arith.mulf %214, %213 : vector<8x128xf32>
    %216 = math.tanh %215 : vector<8x128xf32>
    %cst_72 = arith.constant 1.000000e+00 : f32
    %217 = vector.broadcast %cst_72 : f32 to vector<8x128xf32>
    %218 = arith.addf %216, %217 : vector<8x128xf32>
    %cst_73 = arith.constant 5.000000e-01 : f32
    %219 = vector.broadcast %cst_73 : f32 to vector<8x128xf32>
    %220 = arith.mulf %219, %218 : vector<8x128xf32>
    %221 = vector.extract_strided_slice %199 {offsets = [0, 256], sizes = [8, 128], strides = [1, 1]} : vector<8x384xf32> to vector<8x128xf32>
    %222 = vector.extract_strided_slice %200 {offsets = [0, 256], sizes = [8, 128], strides = [1, 1]} : vector<8x384xf32> to vector<8x128xf32>
    %223 = arith.addf %222, %11 : vector<8x128xf32>
    %224 = arith.mulf %210, %223 : vector<8x128xf32>
    %225 = arith.addf %221, %224 : vector<8x128xf32>
    %226 = math.tanh %225 : vector<8x128xf32>
    %cst_74 = arith.constant 1.000000e+00 : f32
    %227 = vector.broadcast %cst_74 : f32 to vector<8x128xf32>
    %228 = arith.subf %227, %220 : vector<8x128xf32>
    %229 = arith.mulf %228, %226 : vector<8x128xf32>
    %230 = arith.mulf %220, %195 : vector<8x128xf32>
    %231 = arith.addf %229, %230 : vector<8x128xf32>
    %c6_i32 = arith.constant 6 : i32
    %c8_i32_75 = arith.constant 8 : i32
    %232 = arith.muli %c6_i32, %c8_i32_75 : i32
    %233 = tpu.assume_multiple %232, 8 : i32
    %234 = arith.index_cast %233 : i32 to index
    %c0_76 = arith.constant 0 : index
    %235 = vector.load %arg8[%234, %c0_76] : memref<64x384xf32, #tpu.memory_space<vmem>>, vector<8x384xf32>
    %cst_77 = arith.constant dense<0.000000e+00> : vector<8x384xf32>
    %236 = tpu.matmul %231, %8, %cst_77 {dimension_numbers = #tpu.dot_dimension_numbers<[1], [0], [0], [1], [0, 0, 1, 1], [], []>} : vector<8x128xf32>, vector<128x384xf32>, vector<8x384xf32> -> vector<8x384xf32>
    %237 = vector.extract_strided_slice %235 {offsets = [0, 0], sizes = [8, 128], strides = [1, 1]} : vector<8x384xf32> to vector<8x128xf32>
    %238 = vector.extract_strided_slice %236 {offsets = [0, 0], sizes = [8, 128], strides = [1, 1]} : vector<8x384xf32> to vector<8x128xf32>
    %239 = arith.addf %237, %238 : vector<8x128xf32>
    %cst_78 = arith.constant 5.000000e-01 : f32
    %240 = vector.broadcast %cst_78 : f32 to vector<8x128xf32>
    %241 = arith.mulf %240, %239 : vector<8x128xf32>
    %242 = math.tanh %241 : vector<8x128xf32>
    %cst_79 = arith.constant 1.000000e+00 : f32
    %243 = vector.broadcast %cst_79 : f32 to vector<8x128xf32>
    %244 = arith.addf %242, %243 : vector<8x128xf32>
    %cst_80 = arith.constant 5.000000e-01 : f32
    %245 = vector.broadcast %cst_80 : f32 to vector<8x128xf32>
    %246 = arith.mulf %245, %244 : vector<8x128xf32>
    %247 = vector.extract_strided_slice %235 {offsets = [0, 128], sizes = [8, 128], strides = [1, 1]} : vector<8x384xf32> to vector<8x128xf32>
    %248 = vector.extract_strided_slice %236 {offsets = [0, 128], sizes = [8, 128], strides = [1, 1]} : vector<8x384xf32> to vector<8x128xf32>
    %249 = arith.addf %247, %248 : vector<8x128xf32>
    %cst_81 = arith.constant 5.000000e-01 : f32
    %250 = vector.broadcast %cst_81 : f32 to vector<8x128xf32>
    %251 = arith.mulf %250, %249 : vector<8x128xf32>
    %252 = math.tanh %251 : vector<8x128xf32>
    %cst_82 = arith.constant 1.000000e+00 : f32
    %253 = vector.broadcast %cst_82 : f32 to vector<8x128xf32>
    %254 = arith.addf %252, %253 : vector<8x128xf32>
    %cst_83 = arith.constant 5.000000e-01 : f32
    %255 = vector.broadcast %cst_83 : f32 to vector<8x128xf32>
    %256 = arith.mulf %255, %254 : vector<8x128xf32>
    %257 = vector.extract_strided_slice %235 {offsets = [0, 256], sizes = [8, 128], strides = [1, 1]} : vector<8x384xf32> to vector<8x128xf32>
    %258 = vector.extract_strided_slice %236 {offsets = [0, 256], sizes = [8, 128], strides = [1, 1]} : vector<8x384xf32> to vector<8x128xf32>
    %259 = arith.addf %258, %11 : vector<8x128xf32>
    %260 = arith.mulf %246, %259 : vector<8x128xf32>
    %261 = arith.addf %257, %260 : vector<8x128xf32>
    %262 = math.tanh %261 : vector<8x128xf32>
    %cst_84 = arith.constant 1.000000e+00 : f32
    %263 = vector.broadcast %cst_84 : f32 to vector<8x128xf32>
    %264 = arith.subf %263, %256 : vector<8x128xf32>
    %265 = arith.mulf %264, %262 : vector<8x128xf32>
    %266 = arith.mulf %256, %231 : vector<8x128xf32>
    %267 = arith.addf %265, %266 : vector<8x128xf32>
    %c7_i32 = arith.constant 7 : i32
    %c8_i32_85 = arith.constant 8 : i32
    %268 = arith.muli %c7_i32, %c8_i32_85 : i32
    %269 = tpu.assume_multiple %268, 8 : i32
    %270 = arith.index_cast %269 : i32 to index
    %c0_86 = arith.constant 0 : index
    %271 = vector.load %arg8[%270, %c0_86] : memref<64x384xf32, #tpu.memory_space<vmem>>, vector<8x384xf32>
    %cst_87 = arith.constant dense<0.000000e+00> : vector<8x384xf32>
    %272 = tpu.matmul %267, %8, %cst_87 {dimension_numbers = #tpu.dot_dimension_numbers<[1], [0], [0], [1], [0, 0, 1, 1], [], []>} : vector<8x128xf32>, vector<128x384xf32>, vector<8x384xf32> -> vector<8x384xf32>
    %273 = vector.extract_strided_slice %271 {offsets = [0, 0], sizes = [8, 128], strides = [1, 1]} : vector<8x384xf32> to vector<8x128xf32>
    %274 = vector.extract_strided_slice %272 {offsets = [0, 0], sizes = [8, 128], strides = [1, 1]} : vector<8x384xf32> to vector<8x128xf32>
    %275 = arith.addf %273, %274 : vector<8x128xf32>
    %cst_88 = arith.constant 5.000000e-01 : f32
    %276 = vector.broadcast %cst_88 : f32 to vector<8x128xf32>
    %277 = arith.mulf %276, %275 : vector<8x128xf32>
    %278 = math.tanh %277 : vector<8x128xf32>
    %cst_89 = arith.constant 1.000000e+00 : f32
    %279 = vector.broadcast %cst_89 : f32 to vector<8x128xf32>
    %280 = arith.addf %278, %279 : vector<8x128xf32>
    %cst_90 = arith.constant 5.000000e-01 : f32
    %281 = vector.broadcast %cst_90 : f32 to vector<8x128xf32>
    %282 = arith.mulf %281, %280 : vector<8x128xf32>
    %283 = vector.extract_strided_slice %271 {offsets = [0, 128], sizes = [8, 128], strides = [1, 1]} : vector<8x384xf32> to vector<8x128xf32>
    %284 = vector.extract_strided_slice %272 {offsets = [0, 128], sizes = [8, 128], strides = [1, 1]} : vector<8x384xf32> to vector<8x128xf32>
    %285 = arith.addf %283, %284 : vector<8x128xf32>
    %cst_91 = arith.constant 5.000000e-01 : f32
    %286 = vector.broadcast %cst_91 : f32 to vector<8x128xf32>
    %287 = arith.mulf %286, %285 : vector<8x128xf32>
    %288 = math.tanh %287 : vector<8x128xf32>
    %cst_92 = arith.constant 1.000000e+00 : f32
    %289 = vector.broadcast %cst_92 : f32 to vector<8x128xf32>
    %290 = arith.addf %288, %289 : vector<8x128xf32>
    %cst_93 = arith.constant 5.000000e-01 : f32
    %291 = vector.broadcast %cst_93 : f32 to vector<8x128xf32>
    %292 = arith.mulf %291, %290 : vector<8x128xf32>
    %293 = vector.extract_strided_slice %271 {offsets = [0, 256], sizes = [8, 128], strides = [1, 1]} : vector<8x384xf32> to vector<8x128xf32>
    %294 = vector.extract_strided_slice %272 {offsets = [0, 256], sizes = [8, 128], strides = [1, 1]} : vector<8x384xf32> to vector<8x128xf32>
    %295 = arith.addf %294, %11 : vector<8x128xf32>
    %296 = arith.mulf %282, %295 : vector<8x128xf32>
    %297 = arith.addf %293, %296 : vector<8x128xf32>
    %298 = math.tanh %297 : vector<8x128xf32>
    %cst_94 = arith.constant 1.000000e+00 : f32
    %299 = vector.broadcast %cst_94 : f32 to vector<8x128xf32>
    %300 = arith.subf %299, %292 : vector<8x128xf32>
    %301 = arith.mulf %300, %298 : vector<8x128xf32>
    %302 = arith.mulf %292, %267 : vector<8x128xf32>
    %303 = arith.addf %301, %302 : vector<8x128xf32>
    %c8_i32_95 = arith.constant 8 : i32
    %c0_96 = arith.constant 0 : index
    %c0_97 = arith.constant 0 : index
    %304 = vector.load %arg7[%c0_96, %c0_97] : memref<8x128xf32, #tpu.memory_space<vmem>>, vector<8x128xf32>
    tpu.vector_store %arg7[%c0_96, %c0_97], %303 {strides = array<i32>} : memref<8x128xf32, #tpu.memory_space<vmem>>, vector<8x128xf32>,
    return
  }
  func.func @transform_0(%arg0: i32, %arg1: i32) -> (i32, i32, i32) {
    %c0_i32 = arith.constant 0 : i32
    %c0_i32_0 = arith.constant 0 : i32
    return %arg0, %arg1, %c0_i32 : i32, i32, i32
  }
  func.func @transform_1(%arg0: i32, %arg1: i32) -> (i32, i32) {
    %c0_i32 = arith.constant 0 : i32
    %c0_i32_0 = arith.constant 0 : i32
    %c0_i32_1 = arith.constant 0 : i32
    return %c0_i32, %c0_i32_0 : i32, i32
  }
  func.func @transform_2(%arg0: i32, %arg1: i32) -> (i32, i32) {
    %c0_i32 = arith.constant 0 : i32
    %c0_i32_0 = arith.constant 0 : i32
    %c0_i32_1 = arith.constant 0 : i32
    return %c0_i32, %c0_i32_0 : i32, i32
  }
  func.func @transform_3(%arg0: i32, %arg1: i32) -> (i32, i32) {
    %c0_i32 = arith.constant 0 : i32
    %c0_i32_0 = arith.constant 0 : i32
    %c0_i32_1 = arith.constant 0 : i32
    return %c0_i32, %c0_i32_0 : i32, i32
  }
  func.func @transform_4(%arg0: i32, %arg1: i32) -> (i32, i32) {
    %c0_i32 = arith.constant 0 : i32
    %c0_i32_0 = arith.constant 0 : i32
    %c0_i32_1 = arith.constant 0 : i32
    return %c0_i32, %c0_i32_0 : i32, i32
  }
  func.func @transform_5(%arg0: i32, %arg1: i32) -> (i32, i32) {
    %c0_i32 = arith.constant 0 : i32
    %c0_i32_0 = arith.constant 0 : i32
    return %arg0, %c0_i32 : i32, i32
  }
}

</mosaic_0001>

<bundles_post_ra>
// kernel: gru_model_forward.1
= control target key start
LH: loop header
LB: loop body
LE: loop exit
PB: predicated region body
PF: predicated region fallthrough
CT: control target
= control target key end

     0   :  { %vm75_vm0 = vcmask 1043456   ;;  %v2708_v1 = vmov 0.0   ;;  %vm50_vm1 = vcmask 31744   ;;  %v2709_v33 = vmov 0.0|0.0   ;;  %s3333_s1 = inlined_call_operand.vmem [shape: f32[4,384], index: 1, kind: input, shape index: {}]   ;;  %s3334_s0 = inlined_call_operand.vmem [shape: f32[1,64,4], index: 0, kind: input, shape index: {}]   ;;  %s3335_s2 = inlined_call_operand.vmem [shape: f32[128,384], index: 2, kind: input, shape index: {}]   ;;  %s3336_s3 = inlined_call_operand.vmem [shape: f32[1,384], index: 3, kind: input, shape index: {}]   ;;  %s3337_s4 = inlined_call_operand.vmem [shape: f32[1,128], index: 4, kind: input, shape index: {}]   ;;  %s3338_s5 = inlined_call_operand.vmem [shape: f32[8,128], index: 5, kind: output, shape index: {}]  }
   0x1   :  { %v28_v0 = vld [vmem:[%s3333_s1] sm:$0xff]  ;;  %146 = vmatprep.mubr.f32.mxu0 %v2708_v1  ;;  %v325_v3 = vld [vmem:[%s3335_s2 + $0x8] sm:$0xff]  ;;  %v327_v7 = vld [vmem:[%s3335_s2 + $0x18] sm:$0xff]  ;;  %vm2710_vm2 = vmmov 0  }
   0x2   :  { %v20_v2 = vld [vmem:[%s3334_s0] sm:$0xff]  ;;  %v49_v4 = vcombine.high %v28_v0, %v28_v0  ;;  %v331_v10 = vld [vmem:[%s3335_s2 + $0x38] sm:$0xff]  ;;  %v334_v11 = vld [vmem:[%s3335_s2 + $0x50] sm:$0xff] }
   0x3   :  { %v328_v5 = vld [vmem:[%s3335_s2 + $0x20] sm:$0xff]  ;;  %1884 = vmatprep.mubr.msk.f32.mxu1 %vm50_vm1, %v20_v2  ;;  %v2772_v12 = vpack.c.bf16 %v334_v11, %v331_v10  ;;  %v330_v13 = vld [vmem:[%s3335_s2 + $0x30] sm:$0xff]  ;;  %v333_v14 = vld [vmem:[%s3335_s2 + $0x48] sm:$0xff] }
   0x4   :  { %v324_v6 = vld [vmem:[%s3335_s2] sm:$0xff]  ;;  %v2761_v8 = vpack.c.bf16 %v328_v5, %v325_v3  ;;  %1717 = vmatprep.subr.msk.mxu0 %vm75_vm0, %v49_v4  ;;  %v337_v15 = vld [vmem:[%s3335_s2 + $0x68] sm:$0xff]  ;;  %v2794_v18 = vpack.c.bf16 %v333_v14, %v330_v13  ;;  %v339_v21 = vld [vmem:[%s3335_s2 + $0x78] sm:$0xff] }
   0x5   :  { %v2763_v9 = vpack.c.bf16 %v327_v7, %v324_v6  ;;  %1718 = vmatpush1.msk.msra.mxu0 %vm75_vm0, %v28_v0  ;;  %v340_v16 = vld [vmem:[%s3335_s2 + $0x80] sm:$0xff]  ;;  %v21_v17 = vld [vmem:[%s3334_s0 + $0x8] sm:$0xff]  ;;  %v343_v23 = vld [vmem:[%s3335_s2 + $0x98] sm:$0xff] }
   0x6   :  { %1719 = vmatmul.mubr.msk.f32.vlgmr.msra.gmra.mrb[0].mxu0 %vm50_vm1, %v20_v2  ;;  %2177 = vmatprep.subr.bf16.mxu0 %v2761_v8  ;;  %v2797_v19 = vpack.c.bf16 %v340_v16, %v337_v15  ;;  %v336_v20 = vld [vmem:[%s3335_s2 + $0x60] sm:$0xff]  ;;  %v29_v22 = vld [vmem:[%s3333_s1 + $0x8] sm:$0xf]  ;;  %v346_v24 = vld [vmem:[%s3335_s2 + $0xb0] sm:$0xff] }
   0x7   :  { %2179 = vmatpush1.bf16.msra.mxu0 %v2763_v9  ;;  %152 = vmatprep.mubr.f32.mxu0 %v2708_v1  ;;  %v326_v25 = vld [vmem:[%s3335_s2 + $0x10] sm:$0xff]  ;;  %v329_v26 = vld [vmem:[%s3335_s2 + $0x28] sm:$0xff]  ;;  %v2828_v28 = vpack.c.bf16 %v339_v21, %v336_v20  ;;  %v2836_v31 = vpack.c.bf16 %v346_v24, %v343_v23  ;;  %v332_v34 = vld [vmem:[%s3335_s2 + $0x40] sm:$0xff] }
   0x8   :  { %2181 = vmatprep.subr.bf16.mxu0 %v2772_v12  ;;  %1882 = vmatprep.subr.msk.mxu1 %vm75_vm0, %v29_v22  ;;  %v22_v27 = vld [vmem:[%s3334_s0 + $0x10] sm:$0xff]  ;;  %v2833_v30 = vpack.c.bf16 %v329_v26, %v326_v25  ;;  %v345_v32 = vld [vmem:[%s3335_s2 + $0xa8] sm:$0xff]  ;;  %v335_v35 = vld [vmem:[%s3335_s2 + $0x58] sm:$0xff] }
   0x9   :  { %1883 = vmatpush3.msk.msra.mxu1 %vm75_vm0, %v29_v22  ;;  %v342_v29 = vld [vmem:[%s3335_s2 + $0x90] sm:$0xff]  ;;  %v349_v36 = vld [vmem:[%s3335_s2 + $0xc8] sm:$0xff]  ;;  %v352_v37 = vld [vmem:[%s3335_s2 + $0xe0] sm:$0xff]  ;;  %v2857_v38 = vpack.c.bf16 %v335_v35, %v332_v34 }
   0xa   :  { %1720 = vmatmul.mubr.msk.f32.gmra.mrb[2].mxu0 %vm50_vm1, %v21_v17  ;;  %2208 = vmatprep.subr.bf16.mxu1 %v2709_v33  ;;  %v23_v39 = vld [vmem:[%s3334_s0 + $0x18] sm:$0xff]  ;;  %v2864_v40 = vpack.c.bf16 %v345_v32, %v342_v29  ;;  %v338_v41 = vld [vmem:[%s3335_s2 + $0x70] sm:$0xff]  ;;  %v341_v42 = vld [vmem:[%s3335_s2 + $0x88] sm:$0xff]  ;;  %v2873_v43 = vpack.c.bf16 %v352_v37, %v349_v36 }
   0xb   :  { %2183 = vmatpush1.bf16.msra.mxu0 %v2794_v18  ;;  %158 = vmatprep.mubr.f32.mxu0 %v2708_v1  ;;  %v348_v44 = vld [vmem:[%s3335_s2 + $0xc0] sm:$0xff]  ;;  %v351_v45 = vld [vmem:[%s3335_s2 + $0xd8] sm:$0xff]  ;;  %v358_v47 = vld [vmem:[%s3335_s2 + $0x110] sm:$0xff]  ;;  %v2891_v48 = vpack.c.bf16 %v341_v42, %v338_v41 }
   0xc   :  { %2185 = vmatprep.subr.bf16.mxu0 %v2797_v19  ;;  %1885 = vmatmul.mubr.msk.f32.vlgmr.msra.gmra.mrb[0].mxu1 %vm50_vm1, %v21_v17  ;;  %v355_v46 = vld [vmem:[%s3335_s2 + $0xf8] sm:$0xff]  ;;  %v24_v49 = vld [vmem:[%s3334_s0 + $0x20] sm:$0xff]  ;;  %v2898_v50 = vpack.c.bf16 %v351_v45, %v348_v44  ;;  %v354_v54 = vld [vmem:[%s3335_s2 + $0xf0] sm:$0xff] }
   0xd   :  { %2210 = vmatpush3.bf16.msra.mxu1 %v2833_v30  ;;  %1887 = vmatprep.mubr.msk.f32.mxu1 %vm50_vm1, %v22_v27  ;;  %v344_v51 = vld [vmem:[%s3335_s2 + $0xa0] sm:$0xff]  ;;  %v347_v52 = vld [vmem:[%s3335_s2 + $0xb8] sm:$0xff]  ;;  %v2907_v53 = vpack.c.bf16 %v358_v47, %v355_v46  ;;  %v357_v55 = vld [vmem:[%s3335_s2 + $0x108] sm:$0xff] }
   0xe   :  { %1721 = vmatmul.mubr.msk.f32.gmra.mrb[4].mxu0 %vm50_vm1, %v22_v27  ;;  %2211 = vmatprep.subr.bf16.mxu1 %v2709_v33  ;;  %v361_v56 = vld [vmem:[%s3335_s2 + $0x128] sm:$0xff]  ;;  %v364_v57 = vld [vmem:[%s3335_s2 + $0x140] sm:$0xff]  ;;  %v2925_v58 = vpack.c.bf16 %v347_v52, %v344_v51  ;;  %v2932_v60 = vpack.c.bf16 %v357_v55, %v354_v54  ;;  %v350_v61 = vld [vmem:[%s3335_s2 + $0xd0] sm:$0xff]  ;;  %v32_v27 = vlaneseq }
   0xf   :  { %2187 = vmatpush1.bf16.msra.mxu0 %v2828_v28  ;;  %164 = vmatprep.mubr.f32.mxu0 %v2708_v1  ;;  %v25_v59 = vld [vmem:[%s3334_s0 + $0x28] sm:$0xff]  ;;  %v2941_v63 = vpack.c.bf16 %v364_v57, %v361_v56  ;;  %v360_v0 = vld [vmem:[%s3335_s2 + $0x120] sm:$0xff]  ;;  %v363_v2 = vld [vmem:[%s3335_s2 + $0x138] sm:$0xff] }
  0x10   :  { %2189 = vmatprep.subr.bf16.mxu0 %v2836_v31  ;;  %1888 = vmatmul.mubr.msk.f32.gmra.mrb[2].mxu1 %vm50_vm1, %v23_v39  ;;  %v353_v62 = vld [vmem:[%s3335_s2 + $0xe8] sm:$0xff]  ;;  %v367_v3 = vld [vmem:[%s3335_s2 + $0x158] sm:$0xff]  ;;  %v370_v4 = vld [vmem:[%s3335_s2 + $0x170] sm:$0xff]  ;;  %v2966_v7 = vpack.c.bf16 %v363_v2, %v360_v0  ;;  %v33_v29 = vshrl.u32 %v32_v27, 7 }
  0x11   :  { %2213 = vmatpush3.bf16.msra.mxu1 %v2857_v38  ;;  %1890 = vmatprep.mubr.msk.f32.mxu1 %vm50_vm1, %v24_v49  ;;  %v2959_v5 = vpack.c.bf16 %v353_v62, %v350_v61  ;;  %v26_v6 = vld [vmem:[%s3334_s0 + $0x30] sm:$0xff]  ;;  %v356_v10 = vld [vmem:[%s3335_s2 + $0x100] sm:$0xff]  ;;  %v359_v11 = vld [vmem:[%s3335_s2 + $0x118] sm:$0xff]  ;;  %v2975_v13 = vpack.c.bf16 %v370_v4, %v367_v3 }
  0x12   :  { %1722 = vmatmul.mubr.msk.f32.gmra.mrb[6].mxu0 %vm50_vm1, %v23_v39  ;;  %2214 = vmatprep.subr.bf16.mxu1 %v2709_v33  ;;  %v366_v14 = vld [vmem:[%s3335_s2 + $0x150] sm:$0xff]  ;;  %v369_v15 = vld [vmem:[%s3335_s2 + $0x168] sm:$0xff]  ;;  %v2987_v16 = vpack.c.bf16 %v359_v11, %v356_v10  ;;  %v27_v17 = vld [vmem:[%s3334_s0 + $0x38] sm:$0xff]  ;;  %v42_v32 = vsub.s32 2, %v33_v29  ;;  %v34_v51 = vsub.s32 0, %v33_v29  ;;  %v38_v54 = vsub.s32 1, %v33_v29 }
  0x13   :  { %2191 = vmatpush1.bf16.msra.mxu0 %v2864_v40  ;;  %170 = vmatprep.mubr.f32.mxu0 %v2708_v1  ;;  %v2994_v20 = vpack.c.bf16 %v369_v15, %v366_v14  ;;  %v362_v21 = vld [vmem:[%s3335_s2 + $0x130] sm:$0xff]  ;;  %v365_v22 = vld [vmem:[%s3335_s2 + $0x148] sm:$0xff]  ;;  %v368_v24 = vld [vmem:[%s3335_s2 + $0x160] sm:$0xff] }
  0x14   :  { %2193 = vmatprep.subr.bf16.mxu0 %v2873_v43  ;;  %1891 = vmatmul.mubr.msk.f32.gmra.mrb[4].mxu1 %vm50_vm1, %v25_v59  ;;  %v3007_v23 = vpack.c.bf16 %v365_v22, %v362_v21  ;;  %v371_v25 = vld [vmem:[%s3335_s2 + $0x178] sm:$0xff]  ;;  %v30_v34 = vld [vmem:[%s3336_s3] sm:$0x7] }
  0x15   :  { %2216 = vmatpush3.bf16.msra.mxu1 %v2891_v48  ;;  %1893 = vmatprep.mubr.msk.f32.mxu1 %vm50_vm1, %v26_v6  ;;  %v3024_v26 = vpack.c.bf16 %v371_v25, %v368_v24  ;;  %v43_v35 = vrot.slane %v30_v34, %v42_v32  ;;  %v3078_v55 = vrot.slane %v30_v34, %v34_v51  ;;  %v3091_v15 = vld [vmem:[%s3337_s4] ss:$0 sm:$0xff] }
  0x16   :  { %1723 = vmatmul.mubr.msk.f32.gmra.mrb[8].mxu0 %vm50_vm1, %v24_v49  ;;  %2217 = vmatprep.subr.bf16.mxu1 %v2709_v33  ;;  %v3082_v62 = vrot.slane %v30_v34, %v38_v54 }
  0x17   :  { %2195 = vmatpush1.bf16.msra.mxu0 %v2898_v50  ;;  %176 = vmatprep.mubr.f32.mxu0 %v2708_v1 }
  0x18   :  { %2197 = vmatprep.subr.bf16.mxu0 %v2907_v53  ;;  %1894 = vmatmul.mubr.msk.f32.gmra.mrb[6].mxu1 %vm50_vm1, %v27_v17 }
  0x19   :  { %2219 = vmatpush3.bf16.msra.mxu1 %v2925_v58  ;;  %1928 = vmatprep.mubr.msk.f32.mxu1 %vm2710_vm2, %v2708_v1 }
  0x1a   :  { %1724 = vmatmul.mubr.msk.f32.gmra.mrb[10].mxu0 %vm50_vm1, %v25_v59  ;;  %2220 = vmatprep.subr.bf16.mxu1 %v2709_v33 }
  0x1b   :  { %2199 = vmatpush1.bf16.msra.mxu0 %v2932_v60  ;;  %182 = vmatprep.mubr.f32.mxu0 %v2708_v1 }
  0x1c   :  { %2201 = vmatprep.subr.bf16.mxu0 %v2941_v63 }
  0x1d   :  { %2222 = vmatpush3.bf16.msra.mxu1 %v2959_v5 }
  0x1e   :  { %1725 = vmatmul.mubr.msk.f32.gmra.mrb[12].mxu0 %vm50_vm1, %v26_v6  ;;  %2223 = vmatprep.subr.bf16.mxu1 %v2709_v33 }
  0x1f   :  { %2203 = vmatpush1.bf16.msra.mxu0 %v2966_v7  ;;  %188 = vmatprep.mubr.f32.mxu0 %v2708_v1 }
  0x20   :  { %2205 = vmatprep.subr.bf16.mxu0 %v2975_v13 }
  0x21   :  { %2225 = vmatpush3.bf16.msra.mxu1 %v2987_v16 }
  0x22   :  { %1726 = vmatmul.mubr.msk.f32.gmra.mrb[14].mxu0 %vm50_vm1, %v27_v17  ;;  %2226 = vmatprep.subr.bf16.mxu1 %v2709_v33 }
  0x23   :  { %2207 = vmatpush1.bf16.msra.mxu0 %v2994_v20  ;;  %455 = vmatprep.mubr.f32.mxu0 %v2708_v1 }
  0x24   :  { %2233 = vmatprep.subr.bf16.mxu0 %v2761_v8 }
  0x25   :  { %2228 = vmatpush3.bf16.msra.mxu1 %v3007_v23 }
  0x26   :  { %456 = vmatmul.mubr.f32.vlgmr.msra.gmra.mrb[0].mxu0 %v2708_v1  ;;  %2229 = vmatprep.subr.bf16.mxu1 %v2709_v33 }
  0x27   :  { %2235 = vmatpush1.bf16.msra.mxu0 %v2763_v9  ;;  %620 = vmatprep.mubr.f32.mxu0 %v2708_v1 }
  0x28   :  { %2237 = vmatprep.subr.bf16.mxu0 %v2772_v12 }
  0x29   :  { %2231 = vmatpush3.bf16.msra.mxu1 %v3024_v26 }
  0x2a   :  { %2264 = vmatprep.subr.bf16.mxu1 %v2709_v33 }
  0x2b   :  { %2239 = vmatpush1.bf16.msra.mxu0 %v2794_v18 }
  0x2c   :  { %2241 = vmatprep.subr.bf16.mxu0 %v2797_v19  ;;  %1929 = vmatmul.mubr.f32.vlgmr.msra.gmra.mrb[8].mxu1 %v2708_v1 }
  0x2d   :  { %2266 = vmatpush3.bf16.msra.mxu1 %v2833_v30  ;;  %1963 = vmatprep.mubr.msk.f32.mxu1 %vm2710_vm2, %v2708_v1 }
  0x2e   :  { %2267 = vmatprep.subr.bf16.mxu1 %v2709_v33 }
  0x2f   :  { %2243 = vmatpush1.bf16.msra.mxu0 %v2828_v28 }
  0x30   :  { %2245 = vmatprep.subr.bf16.mxu0 %v2836_v31 }
  0x31   :  { %2269 = vmatpush3.bf16.msra.mxu1 %v2857_v38 }
  0x32   :  { %2270 = vmatprep.subr.bf16.mxu1 %v2709_v33 }
  0x33   :  { %2247 = vmatpush1.bf16.msra.mxu0 %v2864_v40 }
  0x34   :  { %2249 = vmatprep.subr.bf16.mxu0 %v2873_v43 }
  0x35   :  { %2272 = vmatpush3.bf16.msra.mxu1 %v2891_v48 }
  0x36   :  { %2273 = vmatprep.subr.bf16.mxu1 %v2709_v33 }
  0x37   :  { %2251 = vmatpush1.bf16.msra.mxu0 %v2898_v50 }
  0x38   :  { %2253 = vmatprep.subr.bf16.mxu0 %v2907_v53 }
  0x39   :  { %2275 = vmatpush3.bf16.msra.mxu1 %v2925_v58 }
  0x3a   :  { %2276 = vmatprep.subr.bf16.mxu1 %v2709_v33 }
  0x3b   :  { %2255 = vmatpush1.bf16.msra.mxu0 %v2932_v60 }
  0x3c   :  { %2257 = vmatprep.subr.bf16.mxu0 %v2941_v63 }
  0x3d   :  { %2278 = vmatpush3.bf16.msra.mxu1 %v2959_v5 }
  0x3e   :  { %2279 = vmatprep.subr.bf16.mxu1 %v2709_v33 }
  0x3f   :  { %2259 = vmatpush1.bf16.msra.mxu0 %v2966_v7 }
  0x40   :  { %2261 = vmatprep.subr.bf16.mxu0 %v2975_v13 }
  0x41   :  { %2281 = vmatpush3.bf16.msra.mxu1 %v2987_v16 }
  0x42   :  { %2282 = vmatprep.subr.bf16.mxu1 %v2709_v33 }
  0x43   :  { %2263 = vmatpush1.bf16.msra.mxu0 %v2994_v20 }
  0x44   :  { %2289 = vmatprep.subr.bf16.mxu0 %v2761_v8 }
  0x45   :  { %2284 = vmatpush3.bf16.msra.mxu1 %v3007_v23 }
  0x46   :  { %2285 = vmatprep.subr.bf16.mxu1 %v2709_v33 }
  0x49   :  { %2287 = vmatpush3.bf16.msra.mxu1 %v3024_v26 }
  0x4a   :  { %2320 = vmatprep.subr.bf16.mxu1 %v2709_v33 }
  0xdf   :  { %v1886_v36 = vpop.f32.mrb[0].mxu1 }
  0xe0   :  { %v3068_v37 = vadd.f32 %v1886_v36, %v43_v35  ;;  %v261_v39 = vpop.f32.mrb[1].mxu1 }
  0xe1   :  { %v262_v25 = vadd.f32 %v261_v39, %v43_v35 }
  0xe3   :  { %v1889_v41 = vpop.f32.mrb[2].mxu1 }
  0xe4   :  { %v3070_v42 = vadd.f32 %v1889_v41, %v43_v35  ;;  %v271_v44 = vpop.f32.mrb[3].mxu1 }
  0xe5   :  { %v3072_v45 = vadd.f32 %v271_v44, %v43_v35 }
  0xe7   :  { %v1892_v46 = vpop.f32.mrb[4].mxu1 }
  0xe8   :  { %v3074_v47 = vadd.f32 %v1892_v46, %v43_v35  ;;  %v281_v49 = vpop.f32.mrb[5].mxu1 }
  0xe9   :  { %v3076_v52 = vadd.f32 %v281_v49, %v43_v35 }
  0xeb   :  { %v1895_v56 = vpop.f32.mrb[6].mxu1 }
  0xec   :  { %v3080_v57 = vadd.f32 %v1895_v56, %v43_v35  ;;  %v291_v59 = vpop.f32.mrb[7].mxu1 }
  0xed   :  { %v3084_v0 = vadd.f32 %v291_v59, %v43_v35 }
  0xf9   :  { %v457_v61 = vpop.f32.mrb[0].mxu0 }
  0xfa   :  { %v2624_v2 = vadd.f32 %v457_v61, %v3078_v55  ;;  %v459_v3 = vpop.f32.mrb[1].mxu0 }
  0xfb   :  { %v2625_v6 = vadd.f32 %v459_v3, %v3082_v62 }
  0xfc   :  { %v533_v4 = vmul.f32 0.5, %v2624_v2 }
  0xfd   :  { %v538_v11 = vmul.f32 0.5, %v2625_v6 }
  0xfe   :  { %2660 = vtanh.f32 %v533_v4 }
  0xff   :  { %v528_v10 = vpop.f32.mrb[8].mxu1  ;;  %2662 = vtanh.f32 %v538_v11 }
 0x100   :  { %v1930_v14 = vpop.f32.mrb[9].mxu1  ;;  %v542_v22 = vadd.f32 %v3091_v15, %v528_v10 }
 0x108   :  { %v2661_v17 = vpop.eup %2660 }
 0x109   :  { %v535_v21 = vadd.f32 1.0, %v2661_v17  ;;  %v2663_v29 = vpop.eup %2662 }
 0x10a   :  { %v540_v34 = vadd.f32 1.0, %v2663_v29 }
 0x10b   :  { %v536_v24 = vmul.f32 0.5, %v535_v21 }
 0x10c   :  { %v541_v36 = vmul.f32 0.5, %v540_v34 }
 0x10d   :  { %v543_v27 = vmul.f32 %v542_v22, %v536_v24 }
 0x10e   :  { %v546_v41 = vsub.f32 1.0, %v541_v36  ;;  %v548_v46 = vmul.f32 0.0, %v541_v36 }
 0x10f   :  { %v544_v32 = vadd.f32 %v543_v27, %v262_v25 }
 0x111   :  { %2664 = vtanh.f32 %v544_v32 }
 0x11b   :  { %v2665_v44 = vpop.eup %2664 }
 0x11c   :  { %v547_v49 = vmul.f32 %v2665_v44, %v546_v41 }
 0x11e   :  { %v549_v51 = vadd.f32 %v548_v46, %v547_v49 }
 0x120   :  { %621 = vmatmul.mubr.f32.vlgmr.msra.gmra.mrb[2].mxu0 %v549_v51  ;;  %1964 = vmatmul.mubr.f32.vlgmr.msra.gmra.mrb[10].mxu1 %v549_v51 }
 0x121   :  { %2291 = vmatpush1.bf16.msra.mxu0 %v2763_v9  ;;  %2322 = vmatpush3.bf16.msra.mxu1 %v2833_v30 }
 0x122   :  { %2293 = vmatprep.subr.bf16.mxu0 %v2772_v12  ;;  %2323 = vmatprep.subr.bf16.mxu1 %v2709_v33 }
 0x123   :  { %785 = vmatprep.mubr.f32.mxu0 %v2708_v1  ;;  %1998 = vmatprep.mubr.msk.f32.mxu1 %vm2710_vm2, %v2708_v1 }
 0x125   :  { %2295 = vmatpush1.bf16.msra.mxu0 %v2794_v18  ;;  %2325 = vmatpush3.bf16.msra.mxu1 %v2857_v38 }
 0x126   :  { %2297 = vmatprep.subr.bf16.mxu0 %v2797_v19  ;;  %2326 = vmatprep.subr.bf16.mxu1 %v2709_v33 }
 0x129   :  { %2299 = vmatpush1.bf16.msra.mxu0 %v2828_v28  ;;  %2328 = vmatpush3.bf16.msra.mxu1 %v2891_v48 }
 0x12a   :  { %2301 = vmatprep.subr.bf16.mxu0 %v2836_v31  ;;  %2329 = vmatprep.subr.bf16.mxu1 %v2709_v33 }
 0x12d   :  { %2303 = vmatpush1.bf16.msra.mxu0 %v2864_v40  ;;  %2331 = vmatpush3.bf16.msra.mxu1 %v2925_v58 }
 0x12e   :  { %2305 = vmatprep.subr.bf16.mxu0 %v2873_v43  ;;  %2332 = vmatprep.subr.bf16.mxu1 %v2709_v33 }
 0x131   :  { %2307 = vmatpush1.bf16.msra.mxu0 %v2898_v50  ;;  %2334 = vmatpush3.bf16.msra.mxu1 %v2959_v5 }
 0x132   :  { %2309 = vmatprep.subr.bf16.mxu0 %v2907_v53  ;;  %2335 = vmatprep.subr.bf16.mxu1 %v2709_v33 }
 0x135   :  { %2311 = vmatpush1.bf16.msra.mxu0 %v2932_v60  ;;  %2337 = vmatpush3.bf16.msra.mxu1 %v2987_v16 }
 0x136   :  { %2313 = vmatprep.subr.bf16.mxu0 %v2941_v63  ;;  %2338 = vmatprep.subr.bf16.mxu1 %v2709_v33 }
 0x139   :  { %2315 = vmatpush1.bf16.msra.mxu0 %v2966_v7  ;;  %2340 = vmatpush3.bf16.msra.mxu1 %v3007_v23 }
 0x13a   :  { %2317 = vmatprep.subr.bf16.mxu0 %v2975_v13  ;;  %2341 = vmatprep.subr.bf16.mxu1 %v2709_v33 }
 0x13d   :  { %2319 = vmatpush1.bf16.msra.mxu0 %v2994_v20  ;;  %2343 = vmatpush3.bf16.msra.mxu1 %v3024_v26 }
 0x13e   :  { %2345 = vmatprep.subr.bf16.mxu0 %v2761_v8  ;;  %2376 = vmatprep.subr.bf16.mxu1 %v2709_v33 }
 0x1f3   :  { %v622_v35 = vpop.f32.mrb[2].mxu0  ;;  %v693_v39 = vpop.f32.mrb[10].mxu1 }
 0x1f4   :  { %v2626_v54 = vadd.f32 %v622_v35, %v3078_v55  ;;  %v624_v56 = vpop.f32.mrb[3].mxu0  ;;  %v1965_v59 = vpop.f32.mrb[11].mxu1  ;;  %v707_v11 = vadd.f32 %v3091_v15, %v693_v39 }
 0x1f5   :  { %v2627_v2 = vadd.f32 %v624_v56, %v3082_v62 }
 0x1f6   :  { %v698_v61 = vmul.f32 0.5, %v2626_v54 }
 0x1f7   :  { %v703_v3 = vmul.f32 0.5, %v2627_v2 }
 0x1f8   :  { %2666 = vtanh.f32 %v698_v61 }
 0x1f9   :  { %2668 = vtanh.f32 %v703_v3 }
 0x202   :  { %v2667_v4 = vpop.eup %2666 }
 0x203   :  { %v700_v6 = vadd.f32 1.0, %v2667_v4  ;;  %v2669_v17 = vpop.eup %2668 }
 0x204   :  { %v705_v22 = vadd.f32 1.0, %v2669_v17 }
 0x205   :  { %v701_v10 = vmul.f32 0.5, %v700_v6 }
 0x206   :  { %v706_v24 = vmul.f32 0.5, %v705_v22 }
 0x207   :  { %v708_v14 = vmul.f32 %v707_v11, %v701_v10 }
 0x208   :  { %v711_v25 = vsub.f32 1.0, %v706_v24  ;;  %v713_v32 = vmul.f32 %v706_v24, %v549_v51 }
 0x209   :  { %v709_v21 = vadd.f32 %v708_v14, %v3068_v37 }
 0x20b   :  { %2670 = vtanh.f32 %v709_v21 }
 0x215   :  { %v2671_v27 = vpop.eup %2670 }
 0x216   :  { %v712_v29 = vmul.f32 %v2671_v27, %v711_v25 }
 0x218   :  { %v714_v34 = vadd.f32 %v713_v32, %v712_v29 }
 0x21a   :  { %786 = vmatmul.mubr.f32.vlgmr.msra.gmra.mrb[4].mxu0 %v714_v34  ;;  %1999 = vmatmul.mubr.f32.vlgmr.msra.gmra.mrb[12].mxu1 %v714_v34 }
 0x21b   :  { %2347 = vmatpush1.bf16.msra.mxu0 %v2763_v9  ;;  %2378 = vmatpush3.bf16.msra.mxu1 %v2833_v30 }
 0x21c   :  { %2349 = vmatprep.subr.bf16.mxu0 %v2772_v12  ;;  %2379 = vmatprep.subr.bf16.mxu1 %v2709_v33 }
 0x21d   :  { %950 = vmatprep.mubr.f32.mxu0 %v2708_v1  ;;  %2033 = vmatprep.mubr.msk.f32.mxu1 %vm2710_vm2, %v2708_v1 }
 0x21f   :  { %2351 = vmatpush1.bf16.msra.mxu0 %v2794_v18  ;;  %2381 = vmatpush3.bf16.msra.mxu1 %v2857_v38 }
 0x220   :  { %2353 = vmatprep.subr.bf16.mxu0 %v2797_v19  ;;  %2382 = vmatprep.subr.bf16.mxu1 %v2709_v33 }
 0x223   :  { %2355 = vmatpush1.bf16.msra.mxu0 %v2828_v28  ;;  %2384 = vmatpush3.bf16.msra.mxu1 %v2891_v48 }
 0x224   :  { %2357 = vmatprep.subr.bf16.mxu0 %v2836_v31  ;;  %2385 = vmatprep.subr.bf16.mxu1 %v2709_v33 }
 0x227   :  { %2359 = vmatpush1.bf16.msra.mxu0 %v2864_v40  ;;  %2387 = vmatpush3.bf16.msra.mxu1 %v2925_v58 }
 0x228   :  { %2361 = vmatprep.subr.bf16.mxu0 %v2873_v43  ;;  %2388 = vmatprep.subr.bf16.mxu1 %v2709_v33 }
 0x22b   :  { %2363 = vmatpush1.bf16.msra.mxu0 %v2898_v50  ;;  %2390 = vmatpush3.bf16.msra.mxu1 %v2959_v5 }
 0x22c   :  { %2365 = vmatprep.subr.bf16.mxu0 %v2907_v53  ;;  %2391 = vmatprep.subr.bf16.mxu1 %v2709_v33 }
 0x22f   :  { %2367 = vmatpush1.bf16.msra.mxu0 %v2932_v60  ;;  %2393 = vmatpush3.bf16.msra.mxu1 %v2987_v16 }
 0x230   :  { %2369 = vmatprep.subr.bf16.mxu0 %v2941_v63  ;;  %2394 = vmatprep.subr.bf16.mxu1 %v2709_v33 }
 0x233   :  { %2371 = vmatpush1.bf16.msra.mxu0 %v2966_v7  ;;  %2396 = vmatpush3.bf16.msra.mxu1 %v3007_v23 }
 0x234   :  { %2373 = vmatprep.subr.bf16.mxu0 %v2975_v13  ;;  %2397 = vmatprep.subr.bf16.mxu1 %v2709_v33 }
 0x237   :  { %2375 = vmatpush1.bf16.msra.mxu0 %v2994_v20  ;;  %2399 = vmatpush3.bf16.msra.mxu1 %v3024_v26 }
 0x238   :  { %2401 = vmatprep.subr.bf16.mxu0 %v2761_v8  ;;  %2432 = vmatprep.subr.bf16.mxu1 %v2709_v33 }
 0x2ed   :  { %v787_v37 = vpop.f32.mrb[4].mxu0  ;;  %v858_v36 = vpop.f32.mrb[12].mxu1 }
 0x2ee   :  { %v2628_v41 = vadd.f32 %v787_v37, %v3078_v55  ;;  %v789_v44 = vpop.f32.mrb[5].mxu0  ;;  %v2000_v46 = vpop.f32.mrb[13].mxu1  ;;  %v872_v59 = vadd.f32 %v3091_v15, %v858_v36 }
 0x2ef   :  { %v2629_v51 = vadd.f32 %v789_v44, %v3082_v62 }
 0x2f0   :  { %v863_v49 = vmul.f32 0.5, %v2628_v41 }
 0x2f1   :  { %v868_v35 = vmul.f32 0.5, %v2629_v51 }
 0x2f2   :  { %2672 = vtanh.f32 %v863_v49 }
 0x2f3   :  { %2674 = vtanh.f32 %v868_v35 }
 0x2fc   :  { %v2673_v39 = vpop.eup %2672 }
 0x2fd   :  { %v865_v54 = vadd.f32 1.0, %v2673_v39  ;;  %v2675_v2 = vpop.eup %2674 }
 0x2fe   :  { %v870_v4 = vadd.f32 1.0, %v2675_v2 }
 0x2ff   :  { %v866_v56 = vmul.f32 0.5, %v865_v54 }
 0x300   :  { %v871_v6 = vmul.f32 0.5, %v870_v4 }
 0x301   :  { %v873_v61 = vmul.f32 %v872_v59, %v866_v56 }
 0x302   :  { %v876_v10 = vsub.f32 1.0, %v871_v6  ;;  %v878_v17 = vmul.f32 %v871_v6, %v714_v34 }
 0x303   :  { %v874_v3 = vadd.f32 %v873_v61, %v3072_v45 }
 0x305   :  { %2676 = vtanh.f32 %v874_v3 }
 0x30f   :  { %v2677_v11 = vpop.eup %2676 }
 0x310   :  { %v877_v14 = vmul.f32 %v2677_v11, %v876_v10 }
 0x312   :  { %v879_v21 = vadd.f32 %v878_v17, %v877_v14 }
 0x314   :  { %951 = vmatmul.mubr.f32.vlgmr.msra.gmra.mrb[6].mxu0 %v879_v21  ;;  %2034 = vmatmul.mubr.f32.vlgmr.msra.gmra.mrb[14].mxu1 %v879_v21 }
 0x315   :  { %2403 = vmatpush1.bf16.msra.mxu0 %v2763_v9  ;;  %2434 = vmatpush3.bf16.msra.mxu1 %v2833_v30 }
 0x316   :  { %2405 = vmatprep.subr.bf16.mxu0 %v2772_v12  ;;  %2435 = vmatprep.subr.bf16.mxu1 %v2709_v33 }
 0x317   :  { %1115 = vmatprep.mubr.f32.mxu0 %v2708_v1  ;;  %2068 = vmatprep.mubr.msk.f32.mxu1 %vm2710_vm2, %v2708_v1 }
 0x319   :  { %2407 = vmatpush1.bf16.msra.mxu0 %v2794_v18  ;;  %2437 = vmatpush3.bf16.msra.mxu1 %v2857_v38 }
 0x31a   :  { %2409 = vmatprep.subr.bf16.mxu0 %v2797_v19  ;;  %2438 = vmatprep.subr.bf16.mxu1 %v2709_v33 }
 0x31d   :  { %2411 = vmatpush1.bf16.msra.mxu0 %v2828_v28  ;;  %2440 = vmatpush3.bf16.msra.mxu1 %v2891_v48 }
 0x31e   :  { %2413 = vmatprep.subr.bf16.mxu0 %v2836_v31  ;;  %2441 = vmatprep.subr.bf16.mxu1 %v2709_v33 }
 0x321   :  { %2415 = vmatpush1.bf16.msra.mxu0 %v2864_v40  ;;  %2443 = vmatpush3.bf16.msra.mxu1 %v2925_v58 }
 0x322   :  { %2417 = vmatprep.subr.bf16.mxu0 %v2873_v43  ;;  %2444 = vmatprep.subr.bf16.mxu1 %v2709_v33 }
 0x325   :  { %2419 = vmatpush1.bf16.msra.mxu0 %v2898_v50  ;;  %2446 = vmatpush3.bf16.msra.mxu1 %v2959_v5 }
 0x326   :  { %2421 = vmatprep.subr.bf16.mxu0 %v2907_v53  ;;  %2447 = vmatprep.subr.bf16.mxu1 %v2709_v33 }
 0x329   :  { %2423 = vmatpush1.bf16.msra.mxu0 %v2932_v60  ;;  %2449 = vmatpush3.bf16.msra.mxu1 %v2987_v16 }
 0x32a   :  { %2425 = vmatprep.subr.bf16.mxu0 %v2941_v63  ;;  %2450 = vmatprep.subr.bf16.mxu1 %v2709_v33 }
 0x32d   :  { %2427 = vmatpush1.bf16.msra.mxu0 %v2966_v7  ;;  %2452 = vmatpush3.bf16.msra.mxu1 %v3007_v23 }
 0x32e   :  { %2429 = vmatprep.subr.bf16.mxu0 %v2975_v13  ;;  %2453 = vmatprep.subr.bf16.mxu1 %v2709_v33 }
 0x331   :  { %2431 = vmatpush1.bf16.msra.mxu0 %v2994_v20  ;;  %2455 = vmatpush3.bf16.msra.mxu1 %v3024_v26 }
 0x332   :  { %2457 = vmatprep.subr.bf16.mxu0 %v2761_v8  ;;  %2488 = vmatprep.subr.bf16.mxu1 %v2709_v33 }
 0x3e7   :  { %v952_v45 = vpop.f32.mrb[6].mxu0  ;;  %v1023_v22 = vpop.f32.mrb[14].mxu1 }
 0x3e8   :  { %v2630_v24 = vadd.f32 %v952_v45, %v3078_v55  ;;  %v954_v25 = vpop.f32.mrb[7].mxu0  ;;  %v2035_v27 = vpop.f32.mrb[15].mxu1  ;;  %v1037_v44 = vadd.f32 %v3091_v15, %v1023_v22 }
 0x3e9   :  { %v2631_v32 = vadd.f32 %v954_v25, %v3082_v62 }
 0x3ea   :  { %v1028_v29 = vmul.f32 0.5, %v2630_v24 }
 0x3eb   :  { %v1033_v34 = vmul.f32 0.5, %v2631_v32 }
 0x3ec   :  { %2678 = vtanh.f32 %v1028_v29 }
 0x3ed   :  { %2680 = vtanh.f32 %v1033_v34 }
 0x3f6   :  { %v2679_v37 = vpop.eup %2678 }
 0x3f7   :  { %v1030_v36 = vadd.f32 1.0, %v2679_v37  ;;  %v2681_v49 = vpop.eup %2680 }
 0x3f8   :  { %v1035_v35 = vadd.f32 1.0, %v2681_v49 }
 0x3f9   :  { %v1031_v41 = vmul.f32 0.5, %v1030_v36 }
 0x3fa   :  { %v1036_v39 = vmul.f32 0.5, %v1035_v35 }
 0x3fb   :  { %v1038_v46 = vmul.f32 %v1037_v44, %v1031_v41 }
 0x3fc   :  { %v1041_v54 = vsub.f32 1.0, %v1036_v39  ;;  %v1043_v61 = vmul.f32 %v1036_v39, %v879_v21 }
 0x3fd   :  { %v1039_v51 = vadd.f32 %v1038_v46, %v3070_v42 }
 0x3ff   :  { %2682 = vtanh.f32 %v1039_v51 }
 0x409   :  { %v2683_v56 = vpop.eup %2682 }
 0x40a   :  { %v1042_v59 = vmul.f32 %v2683_v56, %v1041_v54 }
 0x40c   :  { %v1044_v2 = vadd.f32 %v1043_v61, %v1042_v59 }
 0x40e   :  { %1116 = vmatmul.mubr.f32.vlgmr.msra.gmra.mrb[8].mxu0 %v1044_v2  ;;  %2069 = vmatmul.mubr.f32.vlgmr.msra.gmra.mrb[16].mxu1 %v1044_v2 }
 0x40f   :  { %2459 = vmatpush1.bf16.msra.mxu0 %v2763_v9  ;;  %2490 = vmatpush3.bf16.msra.mxu1 %v2833_v30 }
 0x410   :  { %2461 = vmatprep.subr.bf16.mxu0 %v2772_v12  ;;  %2491 = vmatprep.subr.bf16.mxu1 %v2709_v33 }
 0x411   :  { %1280 = vmatprep.mubr.f32.mxu0 %v2708_v1  ;;  %2103 = vmatprep.mubr.msk.f32.mxu1 %vm2710_vm2, %v2708_v1 }
 0x413   :  { %2463 = vmatpush1.bf16.msra.mxu0 %v2794_v18  ;;  %2493 = vmatpush3.bf16.msra.mxu1 %v2857_v38 }
 0x414   :  { %2465 = vmatprep.subr.bf16.mxu0 %v2797_v19  ;;  %2494 = vmatprep.subr.bf16.mxu1 %v2709_v33 }
 0x417   :  { %2467 = vmatpush1.bf16.msra.mxu0 %v2828_v28  ;;  %2496 = vmatpush3.bf16.msra.mxu1 %v2891_v48 }
 0x418   :  { %2469 = vmatprep.subr.bf16.mxu0 %v2836_v31  ;;  %2497 = vmatprep.subr.bf16.mxu1 %v2709_v33 }
 0x41b   :  { %2471 = vmatpush1.bf16.msra.mxu0 %v2864_v40  ;;  %2499 = vmatpush3.bf16.msra.mxu1 %v2925_v58 }
 0x41c   :  { %2473 = vmatprep.subr.bf16.mxu0 %v2873_v43  ;;  %2500 = vmatprep.subr.bf16.mxu1 %v2709_v33 }
 0x41f   :  { %2475 = vmatpush1.bf16.msra.mxu0 %v2898_v50  ;;  %2502 = vmatpush3.bf16.msra.mxu1 %v2959_v5 }
 0x420   :  { %2477 = vmatprep.subr.bf16.mxu0 %v2907_v53  ;;  %2503 = vmatprep.subr.bf16.mxu1 %v2709_v33 }
 0x423   :  { %2479 = vmatpush1.bf16.msra.mxu0 %v2932_v60  ;;  %2505 = vmatpush3.bf16.msra.mxu1 %v2987_v16 }
 0x424   :  { %2481 = vmatprep.subr.bf16.mxu0 %v2941_v63  ;;  %2506 = vmatprep.subr.bf16.mxu1 %v2709_v33 }
 0x427   :  { %2483 = vmatpush1.bf16.msra.mxu0 %v2966_v7  ;;  %2508 = vmatpush3.bf16.msra.mxu1 %v3007_v23 }
 0x428   :  { %2485 = vmatprep.subr.bf16.mxu0 %v2975_v13  ;;  %2509 = vmatprep.subr.bf16.mxu1 %v2709_v33 }
 0x42b   :  { %2487 = vmatpush1.bf16.msra.mxu0 %v2994_v20  ;;  %2511 = vmatpush3.bf16.msra.mxu1 %v3024_v26 }
 0x42c   :  { %2513 = vmatprep.subr.bf16.mxu0 %v2761_v8  ;;  %2544 = vmatprep.subr.bf16.mxu1 %v2709_v33 }
 0x4e1   :  { %v1117_v42 = vpop.f32.mrb[8].mxu0  ;;  %v1188_v3 = vpop.f32.mrb[16].mxu1 }
 0x4e2   :  { %v2632_v4 = vadd.f32 %v1117_v42, %v3078_v55  ;;  %v1119_v6 = vpop.f32.mrb[9].mxu0  ;;  %v2070_v10 = vpop.f32.mrb[17].mxu1  ;;  %v1202_v24 = vadd.f32 %v3091_v15, %v1188_v3 }
 0x4e3   :  { %v2633_v14 = vadd.f32 %v1119_v6, %v3082_v62 }
 0x4e4   :  { %v1193_v11 = vmul.f32 0.5, %v2632_v4 }
 0x4e5   :  { %v1198_v17 = vmul.f32 0.5, %v2633_v14 }
 0x4e6   :  { %2684 = vtanh.f32 %v1193_v11 }
 0x4e7   :  { %2686 = vtanh.f32 %v1198_v17 }
 0x4f0   :  { %v2685_v21 = vpop.eup %2684 }
 0x4f1   :  { %v1195_v45 = vadd.f32 1.0, %v2685_v21  ;;  %v2687_v27 = vpop.eup %2686 }
 0x4f2   :  { %v1200_v32 = vadd.f32 1.0, %v2687_v27 }
 0x4f3   :  { %v1196_v22 = vmul.f32 0.5, %v1195_v45 }
 0x4f4   :  { %v1201_v34 = vmul.f32 0.5, %v1200_v32 }
 0x4f5   :  { %v1203_v25 = vmul.f32 %v1202_v24, %v1196_v22 }
 0x4f6   :  { %v1206_v37 = vsub.f32 1.0, %v1201_v34  ;;  %v1208_v44 = vmul.f32 %v1201_v34, %v1044_v2 }
 0x4f7   :  { %v1204_v29 = vadd.f32 %v1203_v25, %v3076_v52 }
 0x4f9   :  { %2688 = vtanh.f32 %v1204_v29 }
 0x503   :  { %v2689_v36 = vpop.eup %2688 }
 0x504   :  { %v1207_v41 = vmul.f32 %v2689_v36, %v1206_v37 }
 0x506   :  { %v1209_v46 = vadd.f32 %v1208_v44, %v1207_v41 }
 0x508   :  { %1281 = vmatmul.mubr.f32.vlgmr.msra.gmra.mrb[10].mxu0 %v1209_v46  ;;  %2104 = vmatmul.mubr.f32.vlgmr.msra.gmra.mrb[18].mxu1 %v1209_v46 }
 0x509   :  { %2515 = vmatpush1.bf16.msra.mxu0 %v2763_v9  ;;  %2546 = vmatpush3.bf16.msra.mxu1 %v2833_v30 }
 0x50a   :  { %2517 = vmatprep.subr.bf16.mxu0 %v2772_v12  ;;  %2547 = vmatprep.subr.bf16.mxu1 %v2709_v33 }
 0x50b   :  { %1445 = vmatprep.mubr.f32.mxu0 %v2708_v1  ;;  %2138 = vmatprep.mubr.msk.f32.mxu1 %vm2710_vm2, %v2708_v1 }
 0x50d   :  { %2519 = vmatpush1.bf16.msra.mxu0 %v2794_v18  ;;  %2549 = vmatpush3.bf16.msra.mxu1 %v2857_v38 }
 0x50e   :  { %2521 = vmatprep.subr.bf16.mxu0 %v2797_v19  ;;  %2550 = vmatprep.subr.bf16.mxu1 %v2709_v33 }
 0x511   :  { %2523 = vmatpush1.bf16.msra.mxu0 %v2828_v28  ;;  %2552 = vmatpush3.bf16.msra.mxu1 %v2891_v48 }
 0x512   :  { %2525 = vmatprep.subr.bf16.mxu0 %v2836_v31  ;;  %2553 = vmatprep.subr.bf16.mxu1 %v2709_v33 }
 0x515   :  { %2527 = vmatpush1.bf16.msra.mxu0 %v2864_v40  ;;  %2555 = vmatpush3.bf16.msra.mxu1 %v2925_v58 }
 0x516   :  { %2529 = vmatprep.subr.bf16.mxu0 %v2873_v43  ;;  %2556 = vmatprep.subr.bf16.mxu1 %v2709_v33 }
 0x519   :  { %2531 = vmatpush1.bf16.msra.mxu0 %v2898_v50  ;;  %2558 = vmatpush3.bf16.msra.mxu1 %v2959_v5 }
 0x51a   :  { %2533 = vmatprep.subr.bf16.mxu0 %v2907_v53  ;;  %2559 = vmatprep.subr.bf16.mxu1 %v2709_v33 }
 0x51d   :  { %2535 = vmatpush1.bf16.msra.mxu0 %v2932_v60  ;;  %2561 = vmatpush3.bf16.msra.mxu1 %v2987_v16 }
 0x51e   :  { %2537 = vmatprep.subr.bf16.mxu0 %v2941_v63  ;;  %2562 = vmatprep.subr.bf16.mxu1 %v2709_v33 }
 0x521   :  { %2539 = vmatpush1.bf16.msra.mxu0 %v2966_v7  ;;  %2564 = vmatpush3.bf16.msra.mxu1 %v3007_v23 }
 0x522   :  { %2541 = vmatprep.subr.bf16.mxu0 %v2975_v13  ;;  %2565 = vmatprep.subr.bf16.mxu1 %v2709_v33 }
 0x525   :  { %2543 = vmatpush1.bf16.msra.mxu0 %v2994_v20  ;;  %2567 = vmatpush3.bf16.msra.mxu1 %v3024_v26 }
 0x526   :  { %2569 = vmatprep.subr.bf16.mxu0 %v2761_v8  ;;  %2600 = vmatprep.subr.bf16.mxu1 %v2709_v33 }
 0x5db   :  { %v1282_v52 = vpop.f32.mrb[10].mxu0  ;;  %v1353_v49 = vpop.f32.mrb[18].mxu1 }
 0x5dc   :  { %v2634_v51 = vadd.f32 %v1282_v52, %v3078_v55  ;;  %v1284_v35 = vpop.f32.mrb[11].mxu0  ;;  %v2105_v39 = vpop.f32.mrb[19].mxu1  ;;  %v1367_v3 = vadd.f32 %v3091_v15, %v1353_v49 }
 0x5dd   :  { %v2635_v56 = vadd.f32 %v1284_v35, %v3082_v62 }
 0x5de   :  { %v1358_v54 = vmul.f32 0.5, %v2634_v51 }
 0x5df   :  { %v1363_v59 = vmul.f32 0.5, %v2635_v56 }
 0x5e0   :  { %2690 = vtanh.f32 %v1358_v54 }
 0x5e1   :  { %2692 = vtanh.f32 %v1363_v59 }
 0x5ea   :  { %v2691_v61 = vpop.eup %2690 }
 0x5eb   :  { %v1360_v2 = vadd.f32 1.0, %v2691_v61  ;;  %v2693_v4 = vpop.eup %2692 }
 0x5ec   :  { %v1365_v10 = vadd.f32 1.0, %v2693_v4 }
 0x5ed   :  { %v1361_v42 = vmul.f32 0.5, %v1360_v2 }
 0x5ee   :  { %v1366_v11 = vmul.f32 0.5, %v1365_v10 }
 0x5ef   :  { %v1368_v8 = vmul.f32 %v1367_v3, %v1361_v42 }
 0x5f0   :  { %v1371_v14 = vsub.f32 1.0, %v1366_v11  ;;  %v1373_v45 = vmul.f32 %v1366_v11, %v1209_v46 }
 0x5f1   :  { %v1369_v6 = vadd.f32 %v1368_v8, %v3074_v47 }
 0x5f3   :  { %2694 = vtanh.f32 %v1369_v6 }
 0x5fd   :  { %v2695_v17 = vpop.eup %2694 }
 0x5fe   :  { %v1372_v21 = vmul.f32 %v2695_v17, %v1371_v14 }
 0x600   :  { %v1374_v22 = vadd.f32 %v1373_v45, %v1372_v21 }
 0x602   :  { %1446 = vmatmul.mubr.f32.vlgmr.msra.gmra.mrb[12].mxu0 %v1374_v22  ;;  %2139 = vmatmul.mubr.f32.vlgmr.msra.gmra.mrb[20].mxu1 %v1374_v22 }
 0x603   :  { %2571 = vmatpush1.bf16.msra.mxu0 %v2763_v9  ;;  %2602 = vmatpush3.bf16.msra.mxu1 %v2833_v30 }
 0x604   :  { %2573 = vmatprep.subr.bf16.mxu0 %v2772_v12  ;;  %2603 = vmatprep.subr.bf16.mxu1 %v2709_v33 }
 0x605   :  { %1610 = vmatprep.mubr.f32.mxu0 %v2708_v1  ;;  %2173 = vmatprep.mubr.msk.f32.mxu1 %vm2710_vm2, %v2708_v1 }
 0x607   :  { %2575 = vmatpush1.bf16.msra.mxu0 %v2794_v18  ;;  %2605 = vmatpush3.bf16.msra.mxu1 %v2857_v38 }
 0x608   :  { %2577 = vmatprep.subr.bf16.mxu0 %v2797_v19  ;;  %2606 = vmatprep.subr.bf16.mxu1 %v2709_v33 }
 0x60b   :  { %2579 = vmatpush1.bf16.msra.mxu0 %v2828_v28  ;;  %2608 = vmatpush3.bf16.msra.mxu1 %v2891_v48 }
 0x60c   :  { %2581 = vmatprep.subr.bf16.mxu0 %v2836_v31  ;;  %2609 = vmatprep.subr.bf16.mxu1 %v2709_v33 }
 0x60f   :  { %2583 = vmatpush1.bf16.msra.mxu0 %v2864_v40  ;;  %2611 = vmatpush3.bf16.msra.mxu1 %v2925_v58 }
 0x610   :  { %2585 = vmatprep.subr.bf16.mxu0 %v2873_v43  ;;  %2612 = vmatprep.subr.bf16.mxu1 %v2709_v33 }
 0x613   :  { %2587 = vmatpush1.bf16.msra.mxu0 %v2898_v50  ;;  %2614 = vmatpush3.bf16.msra.mxu1 %v2959_v5 }
 0x614   :  { %2589 = vmatprep.subr.bf16.mxu0 %v2907_v53  ;;  %2615 = vmatprep.subr.bf16.mxu1 %v2709_v33 }
 0x617   :  { %2591 = vmatpush1.bf16.msra.mxu0 %v2932_v60  ;;  %2617 = vmatpush3.bf16.msra.mxu1 %v2987_v16 }
 0x618   :  { %2593 = vmatprep.subr.bf16.mxu0 %v2941_v63  ;;  %2618 = vmatprep.subr.bf16.mxu1 %v2709_v33 }
 0x61b   :  { %2595 = vmatpush1.bf16.msra.mxu0 %v2966_v7  ;;  %2620 = vmatpush3.bf16.msra.mxu1 %v3007_v23 }
 0x61c   :  { %2597 = vmatprep.subr.bf16.mxu0 %v2975_v13  ;;  %2621 = vmatprep.subr.bf16.mxu1 %v2709_v33 }
 0x61f   :  { %2599 = vmatpush1.bf16.msra.mxu0 %v2994_v20  ;;  %2623 = vmatpush3.bf16.msra.mxu1 %v3024_v26 }
 0x6d5   :  { %v1447_v1 = vpop.f32.mrb[12].mxu0  ;;  %v1518_v9 = vpop.f32.mrb[20].mxu1 }
 0x6d6   :  { %v2636_v12 = vadd.f32 %v1447_v1, %v3078_v55  ;;  %v1449_v18 = vpop.f32.mrb[13].mxu0  ;;  %v2140_v19 = vpop.f32.mrb[21].mxu1  ;;  %v1532_v33 = vadd.f32 %v3091_v15, %v1518_v9 }
 0x6d7   :  { %v2637_v30 = vadd.f32 %v1449_v18, %v3082_v62 }
 0x6d8   :  { %v1523_v28 = vmul.f32 0.5, %v2636_v12 }
 0x6d9   :  { %v1528_v31 = vmul.f32 0.5, %v2637_v30 }
 0x6da   :  { %2696 = vtanh.f32 %v1523_v28 }
 0x6db   :  { %2698 = vtanh.f32 %v1528_v31 }
 0x6e4   :  { %v2697_v38 = vpop.eup %2696 }
 0x6e5   :  { %v1525_v40 = vadd.f32 1.0, %v2697_v38  ;;  %v2699_v50 = vpop.eup %2698 }
 0x6e6   :  { %v1530_v58 = vadd.f32 1.0, %v2699_v50 }
 0x6e7   :  { %v1526_v43 = vmul.f32 0.5, %v1525_v40 }
 0x6e8   :  { %v1531_v60 = vmul.f32 0.5, %v1530_v58 }
 0x6e9   :  { %v1533_v48 = vmul.f32 %v1532_v33, %v1526_v43 }
 0x6ea   :  { %v1536_v63 = vsub.f32 1.0, %v1531_v60  ;;  %v1538_v13 = vmul.f32 %v1531_v60, %v1374_v22 }
 0x6eb   :  { %v1534_v53 = vadd.f32 %v1533_v48, %v3084_v0 }
 0x6ed   :  { %2700 = vtanh.f32 %v1534_v53 }
 0x6f7   :  { %v2701_v5 = vpop.eup %2700 }
 0x6f8   :  { %v1537_v7 = vmul.f32 %v2701_v5, %v1536_v63 }
 0x6fa   :  { %v1539_v16 = vadd.f32 %v1538_v13, %v1537_v7 }
 0x6fc   :  { %1611 = vmatmul.mubr.f32.vlgmr.msra.gmra.mrb[14].mxu0 %v1539_v16  ;;  %2174 = vmatmul.mubr.f32.vlgmr.msra.gmra.mrb[22].mxu1 %v1539_v16 }
 0x7cf   :  { %v1612_v20 = vpop.f32.mrb[14].mxu0  ;;  %v1683_v23 = vpop.f32.mrb[22].mxu1 }
 0x7d0   :  { %v2638_v26 = vadd.f32 %v1612_v20, %v3078_v55  ;;  %v1614_v47 = vpop.f32.mrb[15].mxu0  ;;  %v2175_v24 = vpop.f32.mrb[23].mxu1  ;;  %v1697_v37 = vadd.f32 %v3091_v15, %v1683_v23 }
 0x7d1   :  { %v2639_v27 = vadd.f32 %v1614_v47, %v3082_v62 }
 0x7d2   :  { %v1688_v25 = vmul.f32 0.5, %v2638_v26 }
 0x7d3   :  { %v1693_v0 = vmul.f32 0.5, %v2639_v27 }
 0x7d4   :  { %2702 = vtanh.f32 %v1688_v25 }
 0x7d5   :  { %2704 = vtanh.f32 %v1693_v0 }
 0x7de   :  { %v2703_v29 = vpop.eup %2702 }
 0x7df   :  { %v1690_v32 = vadd.f32 1.0, %v2703_v29  ;;  %v2705_v41 = vpop.eup %2704 }
 0x7e0   :  { %v1695_v46 = vadd.f32 1.0, %v2705_v41 }
 0x7e1   :  { %v1691_v34 = vmul.f32 0.5, %v1690_v32 }
 0x7e2   :  { %v1696_v55 = vmul.f32 0.5, %v1695_v46 }
 0x7e3   :  { %v1698_v36 = vmul.f32 %v1697_v37, %v1691_v34 }
 0x7e4   :  { %v1701_v52 = vsub.f32 1.0, %v1696_v55  ;;  %v1703_v35 = vmul.f32 %v1696_v55, %v1539_v16 }
 0x7e5   :  { %v1699_v44 = vadd.f32 %v1698_v36, %v3080_v57 }
 0x7e7   :  { %2706 = vtanh.f32 %v1699_v44 }
 0x7f1   :  { %v2707_v49 = vpop.eup %2706 }
 0x7f2   :  { %v1702_v51 = vmul.f32 %v2707_v49, %v1701_v52 }
 0x7f4   :  { %v1704_v62 = vadd.f32 %v1703_v35, %v1702_v51 }
 0x7f6   :  { %1705 = vst [vmem:[%s3338_s5] sm:$0xff] %v1704_v62 }

</bundles_post_ra>
